<compile_context>
chip_gen: v6e
topology: v6e:2x2x1
jax: 0.10.0
libtpu: 0.0.40
codegen_flags: <defaults>
</compile_context>

<pallas_src>
import functools

import jax
import jax.numpy as jnp
from jax.experimental import pallas as pl
from jax.experimental.pallas import tpu as pltpu


# ----------------------------- in-kernel math helpers ------------------------

_ERF_P = 0.3275911
_ERF_A = (0.254829592, -0.284496736, 1.421413741, -1.453152027, 1.061405429)


def _erf(x):
    """Abramowitz & Stegun 7.1.26 (max abs err ~1.5e-7); exp + VALU only."""
    a = jnp.abs(x)
    t = 1.0 / (1.0 + _ERF_P * a)
    a1, a2, a3, a4, a5 = _ERF_A
    poly = ((((a5 * t + a4) * t + a3) * t + a2) * t + a1) * t
    y = 1.0 - poly * jnp.exp(-a * a)
    return jnp.where(x >= 0.0, y, -y)


def _gelu(x, approximate):
    if approximate:                      # tanh form -> EUP slot (review option)
        c = 0.7978845608028654           # sqrt(2/pi)
        return 0.5 * x * (1.0 + jnp.tanh(c * (x + 0.044715 * x * x * x)))
    # PyTorch nn.GELU() exact-erf semantics.
    return 0.5 * x * (1.0 + _erf(x * 0.7071067811865476))


# ----------------------------- kernels ---------------------------------------

def mlp_kernel(x_ref, w1_ref, b1_ref, w2_ref, b2_ref, w3_ref, b3_ref,
               o_ref, xn_ref, *, gelu_approx):
    """Row tile: 3-layer MLP (bf16 weights, f32 accum) + L2-normalized x."""
    x = x_ref[...].astype(jnp.float32)

    # F.normalize(x, p=2, dim=-1) == x / max(||x||, 1e-12);
    # rsqrt(max(sumsq, 1e-24)) is the same guard, on the EUP.
    inv_norm = jax.lax.rsqrt(
        jnp.maximum(jnp.sum(x * x, axis=-1, keepdims=True), 1e-24))
    xn_ref[...] = (x * inv_norm).astype(xn_ref.dtype)

    h = jnp.dot(x.astype(jnp.bfloat16), w1_ref[...],
                preferred_element_type=jnp.float32) + b1_ref[...]
    h = _gelu(h, gelu_approx)
    h = jnp.dot(h.astype(jnp.bfloat16), w2_ref[...],
                preferred_element_type=jnp.float32) + b2_ref[...]
    h = _gelu(h, gelu_approx)
    out = jnp.dot(h.astype(jnp.bfloat16), w3_ref[...],
                  preferred_element_type=jnp.float32) + b3_ref[...]
    o_ref[...] = out.astype(o_ref.dtype)


def heads_kernel(xn_ref, v_ref, o_ref, inv_ref):
    """One (row, column) tile of the fused weight-norm heads.

    Grid is (col_tiles, row_tiles) with columns OUTER, rows inner: the V tile's
    block index only depends on the outer axis, so it is DMA'd once per column
    tile and stays resident while all row tiles stream through.  The per-column
    1/||v|| is computed once per column tile (row tile 0) into VMEM scratch and
    applied to the f32 accumulator - the column scale commutes with the matmul,
    so no normalized bf16 weight is ever materialized.
    """
    @pl.when(pl.program_id(1) == 0)
    def _():
        vf = v_ref[...].astype(jnp.float32)
        inv_ref[...] = jax.lax.rsqrt(
            jnp.maximum(jnp.sum(vf * vf, axis=0, keepdims=True), 1e-24))

    acc = jnp.dot(xn_ref[...], v_ref[...], preferred_element_type=jnp.float32)
    o_ref[...] = (acc * inv_ref[...]).astype(o_ref.dtype)


# ----------------------------- trace-time tile / VMEM selection --------------

def _cdiv(a, b):
    return (a + b - 1) // b


def _vmem_physical_bytes():
    try:
        info = pltpu.get_tpu_info()
        for attr in ("vmem_capacity_bytes", "vmem_size_bytes", "vmem_bytes"):
            val = getattr(info, attr, None)
            if val:
                return int(val)
    except Exception:
        pass
    return 64 * 1024 * 1024          # conservative default (v7x-sized)


def _pick_row_tile(n, in_dim, hidden, bottleneck, weights_bytes, budget):
    tm = min(256, max(16, _cdiv(n, 16) * 16))
    while tm > 16:
        need = (2 * tm * in_dim * 4          # x tile (f32), double-buffered
                + 2 * tm * bottleneck * 4    # x_proj tile (f32)
                + 2 * tm * in_dim * 2        # xn tile (bf16)
                + 2 * weights_bytes          # resident weights/biases (x2 bufs)
                + 4 * tm * hidden * 4)       # in-kernel f32 intermediates slack
        if need <= budget:
            break
        tm -= 16
    return tm


def _pick_col_tile(in_dim, tot_cols, tm, budget):
    # Per-column cost: V double buffer (bf16) + f32 out double buffer +
    # f32 accumulator + inv scratch.  Fixed cost: xn tile double buffer (bf16).
    denom = 4 * in_dim + 8 * tm + 4 * tm + 8
    fixed = 4 * tm * in_dim
    cap = max(128, (budget - fixed) // max(denom, 1))
    cap = max(128, (cap // 128) * 128)
    if tot_cols <= cap:
        return tot_cols
    for t in range(cap, 127, -128):
        if tot_cols % t == 0:
            return t
    return tot_cols   # TODO(synk): pad fused columns when out_dim % 128 != 0


# ----------------------------- wrapper ----------------------------------------

@functools.partial(jax.jit, static_argnames=("n_head", "tm", "tn", "gelu_approx"))
def multihead_forward(x, params, *, n_head, tm=None, tn=None, gelu_approx=False):
    N, in_dim = x.shape
    hidden = params["w1"].shape[1]
    bottleneck = params["w3"].shape[1]
    v_cat = params["v_cat"]                       # [in_dim, H*out_dim] bf16
    tot_cols = v_cat.shape[1]
    out_dim = tot_cols // n_head

    # --- generation-aware VMEM budget (v7x: 64 MiB, v5e/v6e: 128 MiB) ---
    phys = _vmem_physical_bytes()
    vmem_limit = min(phys * 3 // 4, 100 * 1024 * 1024)
    budget = vmem_limit - 2 * 1024 * 1024

    weights_bytes = sum(int(params[k].size) * params[k].dtype.itemsize
                        for k in ("w1", "b1", "w2", "b2", "w3", "b3"))

    # --- tile selection (Python ints at trace time) ---
    if tm is None:
        tm = _pick_row_tile(N, in_dim, hidden, bottleneck, weights_bytes, budget)
    tm = max(16, (int(tm) // 16) * 16)            # bf16 sublane-packed stores
    n_pad = _cdiv(N, tm) * tm                     # pad, never one giant block

    if tn is None:
        tn = _pick_col_tile(in_dim, tot_cols, tm, budget)
    tn = int(tn)
    if tot_cols % tn != 0 or (tn != tot_cols and tn % 128 != 0):
        tn = tot_cols

    if n_pad != N:
        x = jnp.pad(x, ((0, n_pad - N), (0, 0)))  # only x (small) is padded

    # --- MLP (+ hoisted x L2-normalization), row-tiled, weights resident ---
    x_proj, xn = pl.pallas_call(
        functools.partial(mlp_kernel, gelu_approx=gelu_approx),
        out_shape=(jax.ShapeDtypeStruct((n_pad, bottleneck), jnp.float32),
                   jax.ShapeDtypeStruct((n_pad, in_dim), jnp.bfloat16)),
        grid=(n_pad // tm,),
        in_specs=[
            pl.BlockSpec((tm, in_dim), lambda i: (i, 0)),          # stream x
            pl.BlockSpec((in_dim, hidden), lambda i: (0, 0)),      # W1 resident
            pl.BlockSpec((1, hidden), lambda i: (0, 0)),
            pl.BlockSpec((hidden, hidden), lambda i: (0, 0)),      # W2 resident
            pl.BlockSpec((1, hidden), lambda i: (0, 0)),
            pl.BlockSpec((hidden, bottleneck), lambda i: (0, 0)),  # W3 resident
            pl.BlockSpec((1, bottleneck), lambda i: (0, 0)),
        ],
        out_specs=(pl.BlockSpec((tm, bottleneck), lambda i: (i, 0)),
                   pl.BlockSpec((tm, in_dim), lambda i: (i, 0))),
        compiler_params=pltpu.CompilerParams(
            dimension_semantics=("parallel",),
            vmem_limit_bytes=vmem_limit),
    )(x, params["w1"], params["b1"], params["w2"], params["b2"],
      params["w3"], params["b3"])

    # --- heads: fused lane-dense [in_dim, H*out_dim] matmul, no V transpose ---
    # Columns OUTER (megacore-parallel), rows inner ("arbitrary" because the
    # per-column inv-norm scratch is written at row tile 0 and reused).
    logits = pl.pallas_call(
        heads_kernel,
        out_shape=jax.ShapeDtypeStruct((n_pad, tot_cols), jnp.float32),
        grid=(tot_cols // tn, n_pad // tm),
        in_specs=[
            pl.BlockSpec((tm, in_dim), lambda j, i: (i, 0)),   # stream xn rows
            pl.BlockSpec((in_dim, tn), lambda j, i: (0, j)),   # V tile: 1 DMA/col tile
        ],
        out_specs=pl.BlockSpec((tm, tn), lambda j, i: (i, j)),  # lane-dense vst
        scratch_shapes=[pltpu.VMEM((1, tn), jnp.float32)],      # per-col 1/||v||
        compiler_params=pltpu.CompilerParams(
            dimension_semantics=("parallel", "arbitrary"),
            vmem_limit_bytes=vmem_limit),
    )(xn, v_cat)

    x_proj = x_proj[:N]
    logits = logits[:N].reshape(N, n_head, out_dim)   # head h -> logits[:, h, :]
    return x_proj, logits


# ----------------------------- reference (plain JAX) --------------------------

def ref_forward(x, params, *, gelu_approx=False):
    x = x.astype(jnp.float32)

    def bdot(a, w):
        return jnp.dot(a.astype(jnp.bfloat16), w,
                       preferred_element_type=jnp.float32)

    h = jax.nn.gelu(bdot(x, params["w1"]) + params["b1"], approximate=gelu_approx)
    h = jax.nn.gelu(bdot(h, params["w2"]) + params["b2"], approximate=gelu_approx)
    x_proj = bdot(h, params["w3"]) + params["b3"]

    inv = jax.lax.rsqrt(
        jnp.maximum(jnp.sum(x * x, axis=-1, keepdims=True), 1e-24))
    xn = (x * inv).astype(jnp.bfloat16)

    vf = params["v_cat"].astype(jnp.float32)
    inv_col = jax.lax.rsqrt(
        jnp.maximum(jnp.sum(vf * vf, axis=0, keepdims=True), 1e-24))
    logits = jnp.dot(xn, params["v_cat"],
                     preferred_element_type=jnp.float32) * inv_col
    return x_proj, logits


# ----------------------------- parameter init ---------------------------------

def init_params(key, in_dim, hidden_dim, bottleneck_dim, out_dim, n_head):
    ks = jax.random.split(key, 4)

    def trunc(k, shape, std=0.02):
        return jax.random.truncated_normal(k, -2.0, 2.0, shape, jnp.float32) * std

    return {
        # MLP Linear weights stored transposed [in, out] in bf16; biases f32.
        "w1": trunc(ks[0], (in_dim, hidden_dim)).astype(jnp.bfloat16),
        "b1": jnp.zeros((1, hidden_dim), jnp.float32),
        "w2": trunc(ks[1], (hidden_dim, hidden_dim)).astype(jnp.bfloat16),
        "b2": jnp.zeros((1, hidden_dim), jnp.float32),
        "w3": trunc(ks[2], (hidden_dim, bottleneck_dim)).astype(jnp.bfloat16),
        "b3": jnp.zeros((1, bottleneck_dim), jnp.float32),
        # weight_norm V for ALL heads, pre-transposed and pre-fused at init
        # time to [in_dim, H*out_dim] (column h*out_dim + c == output neuron c
        # of head h); g == 1 (norm_last_layer=True).
        "v_cat": trunc(ks[3], (in_dim, n_head * out_dim)).astype(jnp.bfloat16),
    }


# ----------------------------- main --------------------------------------------

if __name__ == "__main__":
    N, IN_DIM, HIDDEN, BOTTLENECK, OUT_DIM, N_HEAD = 32, 128, 256, 128, 128, 4

    key = jax.random.PRNGKey(0)
    k_x, k_p = jax.random.split(key)
    x = jax.random.normal(k_x, (N, IN_DIM), jnp.float32)
    params = init_params(k_p, IN_DIM, HIDDEN, BOTTLENECK, OUT_DIM, N_HEAD)

    x_proj_ref, logits_ref = ref_forward(x, params)
    logits_ref = logits_ref.reshape(N, N_HEAD, OUT_DIM)

    # Three configurations: multi-step grids (2 row x 2 col tiles), a padded
    # batch (tm=48 > N tile remainder), and fully auto tile selection.
    for kwargs in ({"tm": 16, "tn": 256}, {"tm": 48}, {}):
        x_proj, logits = multihead_forward(x, params, n_head=N_HEAD, **kwargs)
        x_proj = jax.block_until_ready(x_proj)
        logits = jax.block_until_ready(logits)
        assert x_proj.shape == (N, BOTTLENECK)
        assert logits.shape == (N, N_HEAD, OUT_DIM)
        assert jnp.allclose(x_proj, x_proj_ref, atol=3e-3, rtol=2e-2), \
            f"x_proj mismatch ({kwargs})"
        assert jnp.allclose(logits, logits_ref, atol=3e-3, rtol=2e-2), \
            f"logits mismatch ({kwargs})"

    # per-head list, as in the PyTorch module
    logits_list = [logits[:, i, :] for i in range(N_HEAD)]
    assert len(logits_list) == N_HEAD

    print("KERNEL_OK")
</pallas_src>

<mosaic_0001>
module attributes {stable_mosaic.version = 11 : i64} {
  func.func @heads_kernel(%arg0: i32, %arg1: i32, %arg2: memref<16x128xbf16, #tpu.memory_space<vmem>>, %arg3: memref<128x256xbf16, #tpu.memory_space<vmem>>, %arg4: memref<16x256xf32, #tpu.memory_space<vmem>>, %arg5: memref<1x256xf32, #tpu.memory_space<vmem>>) attributes {dimension_semantics = [#tpu.dimension_semantics<parallel>, #tpu.dimension_semantics<arbitrary>], iteration_bounds = array<i64: 2, 2>, scalar_prefetch = 0 : i64, scratch_operands = 1 : i64, tpu.core_type = #tpu.core_type<tc>, window_params = [{transform_indices = @transform_0, window_bounds = array<i64: 16, 128>}, {transform_indices = @transform_1, window_bounds = array<i64: 128, 256>}, {transform_indices = @transform_2, window_bounds = array<i64: 16, 256>}]} {
    %c0_i32 = arith.constant 0 : i32
    %0 = arith.cmpi eq, %arg1, %c0_i32 : i32
    %1 = arith.extui %0 : i1 to i32
    %c0_i32_0 = arith.constant 0 : i32
    %2 = arith.cmpi ne, %1, %c0_i32_0 : i32
    scf.if %2 {
      %c0_8 = arith.constant 0 : index
      %c0_9 = arith.constant 0 : index
      %10 = vector.load %arg3[%c0_8, %c0_9] : memref<128x256xbf16, #tpu.memory_space<vmem>>, vector<128x256xbf16>
      %11 = arith.extf %10 : vector<128x256xbf16> to vector<128x256xf32>
      %12 = arith.mulf %11, %11 : vector<128x256xf32>
      %cst_10 = arith.constant dense<0.000000e+00> : vector<256xf32>
      %13 = vector.multi_reduction <add>, %12, %cst_10 [0] : vector<128x256xf32> to vector<256xf32>
      %14 = vector.shape_cast %13 : vector<256xf32> to vector<1x256xf32>
      %cst_11 = arith.constant 1.000000e-24 : f32
      %15 = vector.broadcast %cst_11 : f32 to vector<1x256xf32>
      %16 = arith.maximumf %14, %15 : vector<1x256xf32>
      %17 = math.rsqrt %16 : vector<1x256xf32>
      %c0_12 = arith.constant 0 : index
      %c0_13 = arith.constant 0 : index
      %18 = vector.load %arg5[%c0_12, %c0_13] : memref<1x256xf32, #tpu.memory_space<vmem>>, vector<1x256xf32>
      tpu.vector_store %arg5[%c0_12, %c0_13], %17 {strides = array<i32>} : memref<1x256xf32, #tpu.memory_space<vmem>>, vector<1x256xf32>,
    } else {
    }
    %c0 = arith.constant 0 : index
    %c0_1 = arith.constant 0 : index
    %3 = vector.load %arg2[%c0, %c0_1] : memref<16x128xbf16, #tpu.memory_space<vmem>>, vector<16x128xbf16>
    %c0_2 = arith.constant 0 : index
    %c0_3 = arith.constant 0 : index
    %4 = vector.load %arg3[%c0_2, %c0_3] : memref<128x256xbf16, #tpu.memory_space<vmem>>, vector<128x256xbf16>
    %cst = arith.constant dense<0.000000e+00> : vector<16x256xf32>
    %5 = tpu.matmul %3, %4, %cst {dimension_numbers = #tpu.dot_dimension_numbers<[1], [0], [0], [1], [0, 0, 1, 1], [], []>} : vector<16x128xbf16>, vector<128x256xbf16>, vector<16x256xf32> -> vector<16x256xf32>
    %c0_4 = arith.constant 0 : index
    %c0_5 = arith.constant 0 : index
    %6 = vector.load %arg5[%c0_4, %c0_5] : memref<1x256xf32, #tpu.memory_space<vmem>>, vector<1x256xf32>
    %7 = vector.broadcast %6 : vector<1x256xf32> to vector<16x256xf32>
    %8 = arith.mulf %5, %7 : vector<16x256xf32>
    %c0_6 = arith.constant 0 : index
    %c0_7 = arith.constant 0 : index
    %9 = vector.load %arg4[%c0_6, %c0_7] : memref<16x256xf32, #tpu.memory_space<vmem>>, vector<16x256xf32>
    tpu.vector_store %arg4[%c0_6, %c0_7], %8 {strides = array<i32>} : memref<16x256xf32, #tpu.memory_space<vmem>>, vector<16x256xf32>,
    return
  }
  func.func @transform_0(%arg0: i32, %arg1: i32) -> (i32, i32) {
    %c0_i32 = arith.constant 0 : i32
    %c0_i32_0 = arith.constant 0 : i32
    return %arg1, %c0_i32 : i32, i32
  }
  func.func @transform_1(%arg0: i32, %arg1: i32) -> (i32, i32) {
    %c0_i32 = arith.constant 0 : i32
    %c0_i32_0 = arith.constant 0 : i32
    return %c0_i32, %arg0 : i32, i32
  }
  func.func @transform_2(%arg0: i32, %arg1: i32) -> (i32, i32) {
    %c0_i32 = arith.constant 0 : i32
    return %arg1, %arg0 : i32, i32
  }
}

module attributes {stable_mosaic.version = 11 : i64} {
  func.func @mlp_kernel(%arg0: i32, %arg1: memref<16x128xf32, #tpu.memory_space<vmem>>, %arg2: memref<128x256xbf16, #tpu.memory_space<vmem>>, %arg3: memref<1x256xf32, #tpu.memory_space<vmem>>, %arg4: memref<256x256xbf16, #tpu.memory_space<vmem>>, %arg5: memref<1x256xf32, #tpu.memory_space<vmem>>, %arg6: memref<256x128xbf16, #tpu.memory_space<vmem>>, %arg7: memref<1x128xf32, #tpu.memory_space<vmem>>, %arg8: memref<16x128xf32, #tpu.memory_space<vmem>>, %arg9: memref<16x128xbf16, #tpu.memory_space<vmem>>) attributes {dimension_semantics = [#tpu.dimension_semantics<parallel>], iteration_bounds = array<i64: 2>, scalar_prefetch = 0 : i64, scratch_operands = 0 : i64, tpu.core_type = #tpu.core_type<tc>, window_params = [{transform_indices = @transform_0, window_bounds = array<i64: 16, 128>}, {pipeline_mode = #tpu.pipeline_mode<synchronous>, transform_indices = @transform_1, window_bounds = array<i64: 128, 256>}, {pipeline_mode = #tpu.pipeline_mode<synchronous>, transform_indices = @transform_2, window_bounds = array<i64: 1, 256>}, {pipeline_mode = #tpu.pipeline_mode<synchronous>, transform_indices = @transform_3, window_bounds = array<i64: 256, 256>}, {pipeline_mode = #tpu.pipeline_mode<synchronous>, transform_indices = @transform_4, window_bounds = array<i64: 1, 256>}, {pipeline_mode = #tpu.pipeline_mode<synchronous>, transform_indices = @transform_5, window_bounds = array<i64: 256, 128>}, {pipeline_mode = #tpu.pipeline_mode<synchronous>, transform_indices = @transform_6, window_bounds = array<i64: 1, 128>}, {transform_indices = @transform_7, window_bounds = array<i64: 16, 128>}, {transform_indices = @transform_8, window_bounds = array<i64: 16, 128>}]} {
    %c0 = arith.constant 0 : index
    %c0_0 = arith.constant 0 : index
    %0 = vector.load %arg1[%c0, %c0_0] : memref<16x128xf32, #tpu.memory_space<vmem>>, vector<16x128xf32>
    %1 = arith.mulf %0, %0 : vector<16x128xf32>
    %cst = arith.constant dense<0.000000e+00> : vector<16xf32>
    %2 = vector.multi_reduction <add>, %1, %cst [1] : vector<16x128xf32> to vector<16xf32>
    %3 = vector.shape_cast %2 : vector<16xf32> to vector<16x1xf32>
    %cst_1 = arith.constant 1.000000e-24 : f32
    %4 = vector.broadcast %cst_1 : f32 to vector<16x1xf32>
    %5 = arith.maximumf %3, %4 : vector<16x1xf32>
    %6 = math.rsqrt %5 : vector<16x1xf32>
    %7 = vector.broadcast %6 : vector<16x1xf32> to vector<16x128xf32>
    %8 = arith.mulf %0, %7 : vector<16x128xf32>
    %9 = arith.truncf %8 : vector<16x128xf32> to vector<16x128xbf16>
    %c0_2 = arith.constant 0 : index
    %c0_3 = arith.constant 0 : index
    %10 = vector.load %arg9[%c0_2, %c0_3] : memref<16x128xbf16, #tpu.memory_space<vmem>>, vector<16x128xbf16>
    tpu.vector_store %arg9[%c0_2, %c0_3], %9 {strides = array<i32>} : memref<16x128xbf16, #tpu.memory_space<vmem>>, vector<16x128xbf16>,
    %11 = arith.truncf %0 : vector<16x128xf32> to vector<16x128xbf16>
    %c0_4 = arith.constant 0 : index
    %c0_5 = arith.constant 0 : index
    %12 = vector.load %arg2[%c0_4, %c0_5] : memref<128x256xbf16, #tpu.memory_space<vmem>>, vector<128x256xbf16>
    %cst_6 = arith.constant dense<0.000000e+00> : vector<16x256xf32>
    %13 = tpu.matmul %11, %12, %cst_6 {dimension_numbers = #tpu.dot_dimension_numbers<[1], [0], [0], [1], [0, 0, 1, 1], [], []>} : vector<16x128xbf16>, vector<128x256xbf16>, vector<16x256xf32> -> vector<16x256xf32>
    %c0_7 = arith.constant 0 : index
    %c0_8 = arith.constant 0 : index
    %14 = vector.load %arg3[%c0_7, %c0_8] : memref<1x256xf32, #tpu.memory_space<vmem>>, vector<1x256xf32>
    %15 = vector.broadcast %14 : vector<1x256xf32> to vector<16x256xf32>
    %16 = arith.addf %13, %15 : vector<16x256xf32>
    %cst_9 = arith.constant 5.000000e-01 : f32
    %17 = vector.broadcast %cst_9 : f32 to vector<16x256xf32>
    %18 = arith.mulf %17, %16 : vector<16x256xf32>
    %cst_10 = arith.constant 0.707106769 : f32
    %19 = vector.broadcast %cst_10 : f32 to vector<16x256xf32>
    %20 = arith.mulf %16, %19 : vector<16x256xf32>
    %21 = math.absf %20 : vector<16x256xf32>
    %cst_11 = arith.constant 0.327591091 : f32
    %22 = vector.broadcast %cst_11 : f32 to vector<16x256xf32>
    %23 = arith.mulf %22, %21 : vector<16x256xf32>
    %cst_12 = arith.constant 1.000000e+00 : f32
    %24 = vector.broadcast %cst_12 : f32 to vector<16x256xf32>
    %25 = arith.addf %24, %23 : vector<16x256xf32>
    %cst_13 = arith.constant 1.000000e+00 : f32
    %26 = vector.broadcast %cst_13 : f32 to vector<16x256xf32>
    %27 = arith.divf %26, %25 : vector<16x256xf32>
    %cst_14 = arith.constant 1.06140542 : f32
    %28 = vector.broadcast %cst_14 : f32 to vector<16x256xf32>
    %29 = arith.mulf %28, %27 : vector<16x256xf32>
    %cst_15 = arith.constant -1.45315206 : f32
    %30 = vector.broadcast %cst_15 : f32 to vector<16x256xf32>
    %31 = arith.addf %29, %30 : vector<16x256xf32>
    %32 = arith.mulf %31, %27 : vector<16x256xf32>
    %cst_16 = arith.constant 1.42141378 : f32
    %33 = vector.broadcast %cst_16 : f32 to vector<16x256xf32>
    %34 = arith.addf %32, %33 : vector<16x256xf32>
    %35 = arith.mulf %34, %27 : vector<16x256xf32>
    %cst_17 = arith.constant -0.284496725 : f32
    %36 = vector.broadcast %cst_17 : f32 to vector<16x256xf32>
    %37 = arith.addf %35, %36 : vector<16x256xf32>
    %38 = arith.mulf %37, %27 : vector<16x256xf32>
    %cst_18 = arith.constant 0.254829586 : f32
    %39 = vector.broadcast %cst_18 : f32 to vector<16x256xf32>
    %40 = arith.addf %38, %39 : vector<16x256xf32>
    %41 = arith.mulf %40, %27 : vector<16x256xf32>
    %cst_19 = arith.constant 0.000000e+00 : f32
    %42 = vector.broadcast %cst_19 : f32 to vector<16x256xf32>
    %43 = arith.subf %42, %21 : vector<16x256xf32>
    %44 = arith.mulf %43, %21 : vector<16x256xf32>
    %45 = math.exp %44 : vector<16x256xf32>
    %46 = arith.mulf %41, %45 : vector<16x256xf32>
    %cst_20 = arith.constant 1.000000e+00 : f32
    %47 = vector.broadcast %cst_20 : f32 to vector<16x256xf32>
    %48 = arith.subf %47, %46 : vector<16x256xf32>
    %cst_21 = arith.constant 0.000000e+00 : f32
    %49 = vector.broadcast %cst_21 : f32 to vector<16x256xf32>
    %50 = arith.cmpf oge, %20, %49 : vector<16x256xf32>
    %cst_22 = arith.constant 0.000000e+00 : f32
    %51 = vector.broadcast %cst_22 : f32 to vector<16x256xf32>
    %52 = arith.subf %51, %48 : vector<16x256xf32>
    %53 = arith.select %50, %48, %52 : vector<16x256xi1>, vector<16x256xf32>
    %cst_23 = arith.constant 1.000000e+00 : f32
    %54 = vector.broadcast %cst_23 : f32 to vector<16x256xf32>
    %55 = arith.addf %54, %53 : vector<16x256xf32>
    %56 = arith.mulf %18, %55 : vector<16x256xf32>
    %57 = arith.truncf %56 : vector<16x256xf32> to vector<16x256xbf16>
    %c0_24 = arith.constant 0 : index
    %c0_25 = arith.constant 0 : index
    %58 = vector.load %arg4[%c0_24, %c0_25] : memref<256x256xbf16, #tpu.memory_space<vmem>>, vector<256x256xbf16>
    %cst_26 = arith.constant dense<0.000000e+00> : vector<16x256xf32>
    %59 = tpu.matmul %57, %58, %cst_26 {dimension_numbers = #tpu.dot_dimension_numbers<[1], [0], [0], [1], [0, 0, 1, 1], [], []>} : vector<16x256xbf16>, vector<256x256xbf16>, vector<16x256xf32> -> vector<16x256xf32>
    %c0_27 = arith.constant 0 : index
    %c0_28 = arith.constant 0 : index
    %60 = vector.load %arg5[%c0_27, %c0_28] : memref<1x256xf32, #tpu.memory_space<vmem>>, vector<1x256xf32>
    %61 = vector.broadcast %60 : vector<1x256xf32> to vector<16x256xf32>
    %62 = arith.addf %59, %61 : vector<16x256xf32>
    %cst_29 = arith.constant 5.000000e-01 : f32
    %63 = vector.broadcast %cst_29 : f32 to vector<16x256xf32>
    %64 = arith.mulf %63, %62 : vector<16x256xf32>
    %cst_30 = arith.constant 0.707106769 : f32
    %65 = vector.broadcast %cst_30 : f32 to vector<16x256xf32>
    %66 = arith.mulf %62, %65 : vector<16x256xf32>
    %67 = math.absf %66 : vector<16x256xf32>
    %cst_31 = arith.constant 0.327591091 : f32
    %68 = vector.broadcast %cst_31 : f32 to vector<16x256xf32>
    %69 = arith.mulf %68, %67 : vector<16x256xf32>
    %cst_32 = arith.constant 1.000000e+00 : f32
    %70 = vector.broadcast %cst_32 : f32 to vector<16x256xf32>
    %71 = arith.addf %70, %69 : vector<16x256xf32>
    %cst_33 = arith.constant 1.000000e+00 : f32
    %72 = vector.broadcast %cst_33 : f32 to vector<16x256xf32>
    %73 = arith.divf %72, %71 : vector<16x256xf32>
    %cst_34 = arith.constant 1.06140542 : f32
    %74 = vector.broadcast %cst_34 : f32 to vector<16x256xf32>
    %75 = arith.mulf %74, %73 : vector<16x256xf32>
    %cst_35 = arith.constant -1.45315206 : f32
    %76 = vector.broadcast %cst_35 : f32 to vector<16x256xf32>
    %77 = arith.addf %75, %76 : vector<16x256xf32>
    %78 = arith.mulf %77, %73 : vector<16x256xf32>
    %cst_36 = arith.constant 1.42141378 : f32
    %79 = vector.broadcast %cst_36 : f32 to vector<16x256xf32>
    %80 = arith.addf %78, %79 : vector<16x256xf32>
    %81 = arith.mulf %80, %73 : vector<16x256xf32>
    %cst_37 = arith.constant -0.284496725 : f32
    %82 = vector.broadcast %cst_37 : f32 to vector<16x256xf32>
    %83 = arith.addf %81, %82 : vector<16x256xf32>
    %84 = arith.mulf %83, %73 : vector<16x256xf32>
    %cst_38 = arith.constant 0.254829586 : f32
    %85 = vector.broadcast %cst_38 : f32 to vector<16x256xf32>
    %86 = arith.addf %84, %85 : vector<16x256xf32>
    %87 = arith.mulf %86, %73 : vector<16x256xf32>
    %cst_39 = arith.constant 0.000000e+00 : f32
    %88 = vector.broadcast %cst_39 : f32 to vector<16x256xf32>
    %89 = arith.subf %88, %67 : vector<16x256xf32>
    %90 = arith.mulf %89, %67 : vector<16x256xf32>
    %91 = math.exp %90 : vector<16x256xf32>
    %92 = arith.mulf %87, %91 : vector<16x256xf32>
    %cst_40 = arith.constant 1.000000e+00 : f32
    %93 = vector.broadcast %cst_40 : f32 to vector<16x256xf32>
    %94 = arith.subf %93, %92 : vector<16x256xf32>
    %cst_41 = arith.constant 0.000000e+00 : f32
    %95 = vector.broadcast %cst_41 : f32 to vector<16x256xf32>
    %96 = arith.cmpf oge, %66, %95 : vector<16x256xf32>
    %cst_42 = arith.constant 0.000000e+00 : f32
    %97 = vector.broadcast %cst_42 : f32 to vector<16x256xf32>
    %98 = arith.subf %97, %94 : vector<16x256xf32>
    %99 = arith.select %96, %94, %98 : vector<16x256xi1>, vector<16x256xf32>
    %cst_43 = arith.constant 1.000000e+00 : f32
    %100 = vector.broadcast %cst_43 : f32 to vector<16x256xf32>
    %101 = arith.addf %100, %99 : vector<16x256xf32>
    %102 = arith.mulf %64, %101 : vector<16x256xf32>
    %103 = arith.truncf %102 : vector<16x256xf32> to vector<16x256xbf16>
    %c0_44 = arith.constant 0 : index
    %c0_45 = arith.constant 0 : index
    %104 = vector.load %arg6[%c0_44, %c0_45] : memref<256x128xbf16, #tpu.memory_space<vmem>>, vector<256x128xbf16>
    %cst_46 = arith.constant dense<0.000000e+00> : vector<16x128xf32>
    %105 = tpu.matmul %103, %104, %cst_46 {dimension_numbers = #tpu.dot_dimension_numbers<[1], [0], [0], [1], [0, 0, 1, 1], [], []>} : vector<16x256xbf16>, vector<256x128xbf16>, vector<16x128xf32> -> vector<16x128xf32>
    %c0_47 = arith.constant 0 : index
    %c0_48 = arith.constant 0 : index
    %106 = vector.load %arg7[%c0_47, %c0_48] : memref<1x128xf32, #tpu.memory_space<vmem>>, vector<1x128xf32>
    %107 = vector.broadcast %106 : vector<1x128xf32> to vector<16x128xf32>
    %108 = arith.addf %105, %107 : vector<16x128xf32>
    %c0_49 = arith.constant 0 : index
    %c0_50 = arith.constant 0 : index
    %109 = vector.load %arg8[%c0_49, %c0_50] : memref<16x128xf32, #tpu.memory_space<vmem>>, vector<16x128xf32>
    tpu.vector_store %arg8[%c0_49, %c0_50], %108 {strides = array<i32>} : memref<16x128xf32, #tpu.memory_space<vmem>>, vector<16x128xf32>,
    return
  }
  func.func @transform_0(%arg0: i32) -> (i32, i32) {
    %c0_i32 = arith.constant 0 : i32
    %c0_i32_0 = arith.constant 0 : i32
    return %arg0, %c0_i32 : i32, i32
  }
  func.func @transform_1(%arg0: i32) -> (i32, i32) {
    %c0_i32 = arith.constant 0 : i32
    %c0_i32_0 = arith.constant 0 : i32
    %c0_i32_1 = arith.constant 0 : i32
    return %c0_i32, %c0_i32_0 : i32, i32
  }
  func.func @transform_2(%arg0: i32) -> (i32, i32) {
    %c0_i32 = arith.constant 0 : i32
    %c0_i32_0 = arith.constant 0 : i32
    %c0_i32_1 = arith.constant 0 : i32
    return %c0_i32, %c0_i32_0 : i32, i32
  }
  func.func @transform_3(%arg0: i32) -> (i32, i32) {
    %c0_i32 = arith.constant 0 : i32
    %c0_i32_0 = arith.constant 0 : i32
    %c0_i32_1 = arith.constant 0 : i32
    return %c0_i32, %c0_i32_0 : i32, i32
  }
  func.func @transform_4(%arg0: i32) -> (i32, i32) {
    %c0_i32 = arith.constant 0 : i32
    %c0_i32_0 = arith.constant 0 : i32
    %c0_i32_1 = arith.constant 0 : i32
    return %c0_i32, %c0_i32_0 : i32, i32
  }
  func.func @transform_5(%arg0: i32) -> (i32, i32) {
    %c0_i32 = arith.constant 0 : i32
    %c0_i32_0 = arith.constant 0 : i32
    %c0_i32_1 = arith.constant 0 : i32
    return %c0_i32, %c0_i32_0 : i32, i32
  }
  func.func @transform_6(%arg0: i32) -> (i32, i32) {
    %c0_i32 = arith.constant 0 : i32
    %c0_i32_0 = arith.constant 0 : i32
    %c0_i32_1 = arith.constant 0 : i32
    return %c0_i32, %c0_i32_0 : i32, i32
  }
  func.func @transform_7(%arg0: i32) -> (i32, i32) {
    %c0_i32 = arith.constant 0 : i32
    %c0_i32_0 = arith.constant 0 : i32
    return %arg0, %c0_i32 : i32, i32
  }
  func.func @transform_8(%arg0: i32) -> (i32, i32) {
    %c0_i32 = arith.constant 0 : i32
    %c0_i32_0 = arith.constant 0 : i32
    return %arg0, %c0_i32 : i32, i32
  }
}

</mosaic_0001>

<bundles_post_ra>
// kernel: multihead_forward.3
= control target key start
LH: loop header
LB: loop body
LE: loop exit
PB: predicated region body
PF: predicated region fallthrough
CT: control target
= control target key end

     0   :  { %s977_s9 = smov 0   ;;  %s979_s10 = smov 0   ;;  %s1171_s0 = inlined_call_operand.vmem [shape: bf16[32,128], index: 0, kind: input, shape index: {}]   ;;  %s1172_s1 = inlined_call_operand.vmem [shape: bf16[128,512], index: 1, kind: input, shape index: {}]   ;;  %s1173_s2 = inlined_call_operand.vmem [shape: f32[32,512], index: 2, kind: output, shape index: {}]  }
   0x1   :  { %s981_s11 = smov 0   ;;  %s983_s12 = smov 0  }
   0x2   :  { %s985_s13 = smov 0   ;;  %s987_s14 = smov 0  }
   0x3   :  { %s989_s15 = smov 0   ;;  %s991_s16 = smov 0  }
   0x4   :  { %s993_s17 = smov 0  }
   0x5 LB: > { %s21_s18 = sadd.s32 1, %s949_s15  ;;  %s24_s19 = sadd.s32 1, %s953_s16  ;;  %s957_s17 = sphi %s993_s17, %s12_s17   ;;  %s953_s16 = sphi %s991_s16, %s1183_s16   ;;  %s949_s15 = sphi %s989_s15, %s1182_s15   ;;  %s945_s14 = sphi %s987_s14, %s1181_s14   ;;  %s941_s13 = sphi %s985_s13, %s1180_s13   ;;  %s937_s12 = sphi %s983_s12, %s1179_s12   ;;  %s933_s11 = sphi %s981_s11, %s1178_s11   ;;  %s929_s10 = sphi %s979_s10, %s1177_s10   ;;  %s925_s9 = sphi %s977_s9, %s1176_s9  }
   0x6   : > { %p22_p0 = scmp.ge.s32.totalorder %s21_s18, 2  ;;  %p64_p1 = scmp.ne.s32.totalorder %s937_s12, %s933_s11 }
   0x7   : > { %s713_s20 = sadd.s32 4294967295, %s957_s17   ;;  %p65_p2 = scmp.eq.s32.totalorder %s957_s17, 0 }
   0x8   : > { %s1185_s18 = smov (%p22_p0, %s21_s18), 0  ;;  %s1187_s19 = smov (!%p22_p0, %s24_s19), %s953_s16 }
   0x9   : > { %p26_p3 = scmp.ge.s32.totalorder %s1187_s19, 2  ;;  %s80_s21 = ssub.s32 %s949_s15, %s1185_s18 }
   0xa   : > { %p1033_p4 = por %p65_p2, %p64_p1  ;;  %p95_p5 = scmp.ne.s32.totalorder %s929_s10, %s925_s9 }
   0xb   : > { %s1189_s19 = smov (%p26_p3, %s1187_s19), 0  ;;  %s57_s23 = sadd.s32 1, %s937_s12 }
   0xc   : > { %p96_p6 = scmp.eq.s32.totalorder %s713_s20, 3  ;;  %s54_s24 = ssub.s32 %s953_s16, %s1189_s19 }
   0xd   : > { %s85_s25 = sadd.s32 1, %s929_s10  ;;  %p55_p7 = scmp.eq.s32.totalorder %s54_s24, 0 }
   0xe   : > { %s82_s26 = sor.u32 %s80_s21, %s54_s24  ;;  %p1045_p9 = por %p96_p6, %p95_p5 }
   0xf   : > { %p83_p8 = scmp.eq.s32.totalorder %s82_s26, 0  ;;  %p716_p10 = scmp.ge.s32.totalorder %s957_s17, 4 }
  0x10   : > { %s1050_s28 = scalar_select %p55_p7, %s937_s12, %s57_s23  }
  0x11   : > { %s1053_s29 = scalar_select %p83_p8, %s929_s10, %s85_s25  }
  0x12   : > { %118 = sbr.rel (%p716_p10) target bundleno = 35 (0x23), region = 16 }
  0x17   : > { %130 = sbr.rel (!%p1033_p4) target bundleno = 35 (0x23), region = 24  ;;  %s132_s30 = sand.u32 (%p1033_p4), 1, %s937_s12  }
  0x18   : > { %s750_s3 = sshll.u32 (%p1033_p4), %s953_s16, 3  ;;  %s717_s4 = sshll.u32 (%p1033_p4), %s132_s30, 7 }
  0x19   : > { %s1063_s7 = scalar_lea.vmem (%p1033_p4), %s1172_s1, %s750_s3  ;;  %s134_s8 = scalar_lea.vmem (%p1033_p4), [#allocation3], %s717_s4 }
  0x1a   : > { %v196_v0 = vld [vmem:[%s1063_s7] sm:$0xff] (%p1033_p4)  ;;  %v198_v1 = vld [vmem:[%s1063_s7 + $0x10] sm:$0xff] (%p1033_p4) }
  0x1b   : > { %v200_v2 = vld [vmem:[%s1063_s7 + $0x20] sm:$0xff] (%p1033_p4)  ;;  %197 = vst [vmem:[%s134_s8] sm:$0xff] (%p1033_p4), %v196_v0  ;;  %199 = vst [vmem:[%s134_s8 + $0x8] sm:$0xff] (%p1033_p4), %v198_v1  ;;  %v202_v3 = vld [vmem:[%s1063_s7 + $0x30] sm:$0xff] (%p1033_p4) }
  0x1c   : > { %201 = vst [vmem:[%s134_s8 + $0x10] sm:$0xff] %v200_v2  ;;  %v204_v4 = vld [vmem:[%s1063_s7 + $0x40] sm:$0xff]  ;;  %v206_v5 = vld [vmem:[%s1063_s7 + $0x50] sm:$0xff]  ;;  %203 = vst [vmem:[%s134_s8 + $0x18] sm:$0xff] %v202_v3 }
  0x1d   : > { %205 = vst [vmem:[%s134_s8 + $0x20] sm:$0xff] %v204_v4  ;;  %207 = vst [vmem:[%s134_s8 + $0x28] sm:$0xff] %v206_v5  ;;  %v208_v6 = vld [vmem:[%s1063_s7 + $0x60] sm:$0xff]  ;;  %v210_v7 = vld [vmem:[%s1063_s7 + $0x70] sm:$0xff] }
  0x1e   : > { %v212_v8 = vld [vmem:[%s1063_s7 + $0x80] sm:$0xff]  ;;  %209 = vst [vmem:[%s134_s8 + $0x30] sm:$0xff] %v208_v6  ;;  %211 = vst [vmem:[%s134_s8 + $0x38] sm:$0xff] %v210_v7  ;;  %v214_v9 = vld [vmem:[%s1063_s7 + $0x90] sm:$0xff] }
  0x1f   : > { %213 = vst [vmem:[%s134_s8 + $0x40] sm:$0xff] %v212_v8  ;;  %v216_v10 = vld [vmem:[%s1063_s7 + $0xa0] sm:$0xff]  ;;  %v218_v11 = vld [vmem:[%s1063_s7 + $0xb0] sm:$0xff]  ;;  %215 = vst [vmem:[%s134_s8 + $0x48] sm:$0xff] %v214_v9 }
  0x20   : > { %217 = vst [vmem:[%s134_s8 + $0x50] sm:$0xff] %v216_v10  ;;  %219 = vst [vmem:[%s134_s8 + $0x58] sm:$0xff] %v218_v11  ;;  %v220_v12 = vld [vmem:[%s1063_s7 + $0xc0] sm:$0xff]  ;;  %v222_v13 = vld [vmem:[%s1063_s7 + $0xd0] sm:$0xff] }
  0x21   : > { %v224_v14 = vld [vmem:[%s1063_s7 + $0xe0] sm:$0xff]  ;;  %221 = vst [vmem:[%s134_s8 + $0x60] sm:$0xff] %v220_v12  ;;  %223 = vst [vmem:[%s134_s8 + $0x68] sm:$0xff] %v222_v13  ;;  %v226_v15 = vld [vmem:[%s1063_s7 + $0xf0] sm:$0xff] }
  0x22   : > { %225 = vst [vmem:[%s134_s8 + $0x70] sm:$0xff] %v224_v14  ;;  %227 = vst [vmem:[%s134_s8 + $0x78] sm:$0xff] %v226_v15 }
  0x23 PF: > { %p720_p11 = scmp.ge.s32.totalorder %s957_s17, 1  ;;  %p232_p12 = scmp.lt.s32.totalorder %s957_s17, 5 }
  0x25   : > { %p233_p13 = pnand %p720_p11, %p232_p12 }
  0x26   : > { %s239_s20 = sand.u32 (!%p233_p13), 1, %s933_s11   ;;  %s261_s21 = sand.u32 (!%p233_p13), 1, %s925_s9  }
  0x27   : > { %236 = sbr.rel (%p233_p13) target bundleno = 353 (0x161), region = 62  ;;  %s721_s22 = sshll.u32 (!%p233_p13), %s239_s20, 7 }
  0x28   : > { %s722_s23 = sshll.u32 (!%p233_p13), %s261_s21, 5  ;;  %s723_s24 = sshll.u32 (!%p233_p13), %s941_s13, 1 }
  0x29   : > { %p265_p0 = scmp.lt.s32.totalorder (!%p233_p13), %s723_s24, 3  ;;  %s1091_s4 = scalar_lea.vmem (!%p233_p13), [#allocation3], %s721_s22 }
  0x2a   : > { %s1093_s5 = scalar_lea.vmem (!%p233_p13), [#allocation4], %s722_s23  ;;  %p725_p1 = scmp.ne.s32.totalorder (!%p233_p13), %s941_s13, 0 }
  0x2c   : > { %s1191_s24 = smov (!%p265_p0, %s723_s24), 3  ;;  %277 = sbr.rel (%p725_p1) target bundleno = 110 (0x6e), region = 70 }
  0x2d   : > { %s724_s25 = sshll.u32 %s1191_s24, 2 }
  0x2e   : > { %s1089_s3 = scalar_lea.vmem %s1171_s0, %s724_s25 }
  0x31   : > { %v278_v16 = vld [vmem:[%s1091_s4] sm:$0xff]  ;;  %v279_v17 = vld [vmem:[%s1091_s4 + $0x8] sm:$0xff]  ;;  %v280_v18 = vld [vmem:[%s1091_s4 + $0x10] sm:$0xff]  ;;  %v959_v36 = vmov 1935823168   ;;  %v913_v39 = vlaneseq }
  0x32   : > { %v281_v19 = vld [vmem:[%s1091_s4 + $0x18] sm:$0xff]  ;;  %v282_v20 = vld [vmem:[%s1091_s4 + $0x20] sm:$0xff]  ;;  %v283_v21 = vld [vmem:[%s1091_s4 + $0x28] sm:$0xff]  ;;  %891 = vmul.bf16.f32.vacc0 %v278_v16, %v278_v16  ;;  %v911_v37 = vunpack.c.l.s4 %v959_v36  ;;  %v960_v58 = vmov 1966171168  }
  0x33   : > { %v284_v22 = vld [vmem:[%s1091_s4 + $0x30] sm:$0xff]  ;;  %v285_v23 = vld [vmem:[%s1091_s4 + $0x38] sm:$0xff]  ;;  %892 = vmac.bf16.f32.vacc0 %v279_v17, %v279_v17  ;;  %v286_v24 = vld [vmem:[%s1091_s4 + $0x40] sm:$0xff]  ;;  %v914_v40 = vshrl.u32 %v913_v39, 7  ;;  %v408_v59 = vunpack.c.l.s4 %v960_v58  ;;  %vm424_vm0 = vcmp.lt.s32.totalorder %v913_v39, 256 }
  0x34   : > { %893 = vmac.bf16.f32.vacc0 %v280_v18, %v280_v18  ;;  %v287_v25 = vld [vmem:[%s1091_s4 + $0x48] sm:$0xff]  ;;  %v288_v26 = vld [vmem:[%s1091_s4 + $0x50] sm:$0xff]  ;;  %v289_v27 = vld [vmem:[%s1091_s4 + $0x58] sm:$0xff]  ;;  %v912_v38 = vunpack.c.0.s8 %v911_v37 }
  0x35   : > { %894 = vmac.bf16.f32.vacc0 %v281_v19, %v281_v19  ;;  %v290_v28 = vld [vmem:[%s1091_s4 + $0x60] sm:$0xff]  ;;  %v291_v29 = vld [vmem:[%s1091_s4 + $0x68] sm:$0xff]  ;;  %v292_v30 = vld [vmem:[%s1091_s4 + $0x70] sm:$0xff]  ;;  %v409_v60 = vunpack.c.0.s8 %v408_v59 }
  0x36   : > { %895 = vmac.bf16.f32.vacc0 %v282_v20, %v282_v20  ;;  %v293_v31 = vld [vmem:[%s1091_s4 + $0x78] sm:$0xff]  ;;  %v915_v41 = vsub.s32 %v912_v38, %v914_v40 }
  0x37   : > { %896 = vmac.bf16.f32.vacc0 %v283_v21, %v283_v21  ;;  %v412_v62 = vsub.s32 %v409_v60, %v914_v40 }
  0x38   : > { %897 = vmac.bf16.f32.vacc0 %v284_v22, %v284_v22 }
  0x39   : > { %898 = vmac.bf16.f32.vacc0 %v285_v23, %v285_v23 }
  0x3a   : > { %899 = vmac.bf16.f32.vacc0 %v286_v24, %v286_v24 }
  0x3b   : > { %900 = vmac.bf16.f32.vacc0 %v287_v25, %v287_v25 }
  0x3c   : > { %901 = vmac.bf16.f32.vacc0 %v288_v26, %v288_v26 }
  0x3d   : > { %902 = vmac.bf16.f32.vacc0 %v289_v27, %v289_v27 }
  0x3e   : > { %903 = vmac.bf16.f32.vacc0 %v290_v28, %v290_v28 }
  0x3f   : > { %904 = vmac.bf16.f32.vacc0 %v291_v29, %v291_v29 }
  0x40   : > { %905 = vmac.bf16.f32.vacc0 %v292_v30, %v292_v30 }
  0x41   : > { %906 = vmac.bf16.f32.vacc0 %v293_v31, %v293_v31 }
  0x43   : > { %v907_v32 = vmovacc.add.low.vacc0 }
  0x44   : > { %v908_v33 = vmovacc.add.high.vacc0 }
  0x46   : > { %v909_v34 = vcombine.low %v907_v32, %v908_v33  ;;  %v910_v35 = vcombine.high %v907_v32, %v908_v33 }
  0x48   : > { %v916_v42 = vrot.slane %v909_v34, %v915_v41  ;;  %v922_v43 = vrot.slane %v910_v35, %v915_v41 }
  0x4a   : > { %v373_v44 = vrot.slane %v916_v42, 4  ;;  %v394_v45 = vrot.slane %v922_v43, 4 }
  0x4c   : > { %v374_v46 = vadd.f32 %v916_v42, %v373_v44  ;;  %v395_v47 = vadd.f32 %v922_v43, %v394_v45 }
  0x4e   : > { %v375_v48 = vrot.slane %v374_v46, 2  ;;  %v396_v49 = vrot.slane %v395_v47, 2 }
  0x50   : > { %v376_v50 = vadd.f32 %v375_v48, %v374_v46  ;;  %v397_v51 = vadd.f32 %v396_v49, %v395_v47 }
  0x52   : > { %v377_v52 = vrot.slane %v376_v50, 1  ;;  %v398_v53 = vrot.slane %v397_v51, 1 }
  0x54   : > { %v378_v54 = vadd.f32 %v377_v52, %v376_v50  ;;  %v399_v55 = vadd.f32 %v398_v53, %v397_v51 }
  0x56   : > { %v400_v56 = vmax.f32 %v378_v54, 1e-24  ;;  %v401_v57 = vmax.f32 %v399_v55, 1e-24 }
  0x58   : > { %826 = vrsqrt.f32 %v400_v56 }
  0x59   : > { %828 = vrsqrt.f32 %v401_v57 }
  0x65   : > { %v827_v61 = vpop.eup %826 }
  0x66   : > { %v829_v63 = vpop.eup %828 }
  0x67   : > { %v406_v0 = vcombine.low %v827_v61, %v829_v63 }
  0x69   : > { %v413_v1 = vrot.slane %v406_v0, %v412_v62 }
  0x6b   : > { %v420_v2 = vrot.slane %v413_v1, %v412_v62 }
  0x6d   : > { %426 = vst.msk [vmem:[#allocation2] sm:$0x3] %vm424_vm0, %v420_v2 }
  0x6e PF: > { %v830_v3 = vld [vmem:[%s1091_s4 + $0x74] ss:$8 sps:$4 sm:$0xff]   ;;  %v832_v4 = vld [vmem:[%s1091_s4 + $0x70] ss:$8 sps:$4 sm:$0xff]   ;;  %v961_v5 = vmov 0   ;;  %v576_v21 = vlaneseq  ;;  %s745_s9 = sshll.u32 (%p1045_p9), %s945_s14, 1 }
  0x6f   : > { %563 = vmatprep.mubr.bf16.mxu0 %v961_v5  ;;  %531 = vmatprep.subr.bf16.mxu0 %v830_v3  ;;  %v833_v6 = vld [vmem:[%s1091_s4 + $0x64] ss:$8 sps:$4 sm:$0xff]   ;;  %v835_v7 = vld [vmem:[%s1091_s4 + $0x60] ss:$8 sps:$4 sm:$0xff]   ;;  %v836_v8 = vld [vmem:[%s1091_s4 + $0x54] ss:$8 sps:$4 sm:$0xff]  }
  0x70   : > { %532 = vmatpush1.bf16.msra.mxu0 %v832_v4  ;;  %v838_v9 = vld [vmem:[%s1091_s4 + $0x50] ss:$8 sps:$4 sm:$0xff]   ;;  %v839_v10 = vld [vmem:[%s1091_s4 + $0x44] ss:$8 sps:$4 sm:$0xff]   ;;  %v841_v11 = vld [vmem:[%s1091_s4 + $0x40] ss:$8 sps:$4 sm:$0xff]  }
  0x71   : > { %533 = vmatprep.subr.bf16.mxu0 %v833_v6  ;;  %v842_v12 = vld [vmem:[%s1091_s4 + $0x34] ss:$8 sps:$4 sm:$0xff]   ;;  %v844_v13 = vld [vmem:[%s1091_s4 + $0x30] ss:$8 sps:$4 sm:$0xff]   ;;  %v845_v14 = vld [vmem:[%s1091_s4 + $0x24] ss:$8 sps:$4 sm:$0xff]  }
  0x72   : > { %v847_v15 = vld [vmem:[%s1091_s4 + $0x20] ss:$8 sps:$4 sm:$0xff]   ;;  %v848_v16 = vld [vmem:[%s1091_s4 + $0x14] ss:$8 sps:$4 sm:$0xff]   ;;  %v850_v17 = vld [vmem:[%s1091_s4 + $0x10] ss:$8 sps:$4 sm:$0xff]  }
  0x73   : > { %v851_v18 = vld [vmem:[%s1091_s4 + $0x4] ss:$8 sps:$4 sm:$0xff]   ;;  %v853_v19 = vld [vmem:[%s1091_s4] ss:$8 sps:$4 sm:$0xff]   ;;  %v577_v22 = vshrl.u32 %v576_v21, 7  ;;  %s751_s11 = sshll.u32 (%p1045_p9), %s941_s13, 3 }
  0x74   : > { %534 = vmatpush1.bf16.msra.mxu0 %v835_v7  ;;  %v854_v20 = vld [vmem:[%s1089_s3] sm:$0xff]   ;;  %s604_s6 = sadd.s32 (%p1045_p9), %s751_s11, %s745_s9 }
  0x75   : > { %535 = vmatprep.subr.bf16.mxu0 %v836_v8  ;;  %v578_v23 = vsub.s32 0, %v577_v22  ;;  %v574_v24 = vld [vmem:[#allocation2] sm:$0x3]  ;;  %v582_v25 = vsub.s32 1, %v577_v22  ;;  %s747_s7 = sshll.u32 (%p1045_p9), %s604_s6, 3 }
  0x76   : > { %s606_s21 = scalar_lea.vmem (%p1045_p9), %s1173_s2, %s747_s7 }
  0x77   : > { %v579_v26 = vrot.slane %v574_v24, %v578_v23  ;;  %v583_v27 = vrot.slane %v574_v24, %v582_v25 }
  0x78   : > { %536 = vmatpush1.bf16.msra.mxu0 %v838_v9 }
  0x79   : > { %537 = vmatprep.subr.bf16.mxu0 %v839_v10 }
  0x7c   : > { %538 = vmatpush1.bf16.msra.mxu0 %v841_v11 }
  0x7d   : > { %539 = vmatprep.subr.bf16.mxu0 %v842_v12 }
  0x80   : > { %540 = vmatpush1.bf16.msra.mxu0 %v844_v13 }
  0x81   : > { %541 = vmatprep.subr.bf16.mxu0 %v845_v14 }
  0x84   : > { %542 = vmatpush1.bf16.msra.mxu0 %v847_v15 }
  0x85   : > { %543 = vmatprep.subr.bf16.mxu0 %v848_v16 }
  0x88   : > { %544 = vmatpush1.bf16.msra.mxu0 %v850_v17 }
  0x89   : > { %545 = vmatprep.subr.bf16.mxu0 %v851_v18 }
  0x8c   : > { %546 = vmatpush1.bf16.msra.mxu0 %v853_v19 }
  0x8f   : > { %564 = vmatmul.mubr.bf16.vlgmr.msra.gmra.mxu0 %v854_v20 }
 0x14f   : > { %v565_v28 = vpop.f32.mrf.mxu0 }
 0x150   : > { %v586_v29 = vmul.f32 %v579_v26, %v565_v28 }
 0x151   : > { %v567_v30 = vpop.f32.mrf.mxu0 }
 0x152   : > { %590 = vst [vmem:[%s1093_s5] sm:$0xff] %v586_v29  ;;  %v587_v31 = vmul.f32 %v583_v27, %v567_v30 }
 0x153   : > { %v569_v32 = vpop.f32.mrf.mxu0 }
 0x154   : > { %591 = vst [vmem:[%s1093_s5 + $0x8] sm:$0xff] %v587_v31  ;;  %v588_v33 = vmul.f32 %v579_v26, %v569_v32  ;;  %600 = sbr.rel (!%p1045_p9) target bundleno = 353 (0x161), region = 74 }
 0x155   : > { %v571_v34 = vpop.f32.mrf.mxu0 }
 0x156   : > { %592 = vst [vmem:[%s1093_s5 + $0x10] sm:$0xff] %v588_v33  ;;  %v589_v35 = vmul.f32 %v583_v27, %v571_v34 }
 0x158   : > { %593 = vst [vmem:[%s1093_s5 + $0x18] sm:$0xff] %v589_v35 }
 0x159   : > { %v619_v36 = vld [vmem:[%s1093_s5] sm:$0xff] }
 0x15a   : > { %620 = vst [vmem:[%s606_s21] sm:$0xff] %v619_v36 }
 0x15b   : > { %v621_v37 = vld [vmem:[%s1093_s5 + $0x8] sm:$0xff] }
 0x15c   : > { %622 = vst [vmem:[%s606_s21 + $0x8] sm:$0xff] %v621_v37 }
 0x15d   : > { %v623_v38 = vld [vmem:[%s1093_s5 + $0x10] sm:$0xff] }
 0x15e   : > { %624 = vst [vmem:[%s606_s21 + $0x20] sm:$0xff] %v623_v38 }
 0x15f   : > { %v625_v39 = vld [vmem:[%s1093_s5 + $0x18] sm:$0xff] }
 0x160   : > { %626 = vst [vmem:[%s606_s21 + $0x28] sm:$0xff] %v625_v39 }
 0x161 PF: > { %s12_s17 = sadd.s32 1, %s957_s17   ;;  %s1176_s9 = smov %s929_s10 }
 0x162   : > { %p9_p2 = scmp.ge.s32.totalorder %s12_s17, 6   ;;  %s1177_s10 = smov %s1053_s29 }
 0x163   : > { %s1178_s11 = smov %s937_s12  ;;  %s1179_s12 = smov %s1050_s28 }
 0x164   : > { %s1180_s13 = smov %s949_s15  ;;  %s1181_s14 = smov %s953_s16 }
 0x165   : > { %s1182_s15 = smov %s1185_s18  ;;  %s1183_s16 = smov %s1189_s19 }
 0x166   :  { %11 = sbr.rel (!%p9_p2) target bundleno = 5 (0x5), region = 131 }

// kernel: multihead_forward.2
= control target key start
LH: loop header
LB: loop body
LE: loop exit
PB: predicated region body
PF: predicated region fallthrough
CT: control target
= control target key end

     0   :  { %s2304_s0 = inlined_call_operand.hbm [shape: f32[32,128], index: 0, kind: input, shape index: {}]   ;;  %s2305_s1 = inlined_call_operand.hbm [shape: bf16[128,256], index: 1, kind: input, shape index: {}]   ;;  %s2306_s2 = inlined_call_operand.hbm [shape: f32[1,256], index: 2, kind: input, shape index: {}]   ;;  %s2307_s3 = inlined_call_operand.hbm [shape: bf16[256,256], index: 3, kind: input, shape index: {}]   ;;  %s2308_s4 = inlined_call_operand.vmem [shape: f32[1,256], index: 4, kind: input, shape index: {}]   ;;  %s2309_s5 = inlined_call_operand.hbm [shape: bf16[256,128], index: 5, kind: input, shape index: {}]   ;;  %s2310_s6 = inlined_call_operand.vmem [shape: f32[1,128], index: 6, kind: input, shape index: {}]   ;;  %s2311_s7 = inlined_call_operand.hbm [shape: f32[32,128], index: 7, kind: output, shape index: {0}]   ;;  %s2312_s8 = inlined_call_operand.vmem [shape: bf16[32,128], index: 8, kind: output, shape index: {1}]  }
   0x1   :  { %2319 = sst [smem:[#allocation16_spill]] %s2305_s1 }
   0x2   :  { %2320 = sst [smem:[#allocation17_spill]] %s2306_s2 }
   0x3   :  { %14 = vsyncpa [#allocation3], 0 }
   0x4   :  { %16 = vsyncpa [#allocation3 + $0x1], 0 }
   0x5   :  { %17 = vsyncpa [#allocation6], 0 }
   0x6   :  { %18 = vsyncpa [#allocation9], 0 }
   0x7   :  { %19 = vsyncpa [#allocation4], 0 }
   0x8   :  { %21 = vsyncpa [#allocation4 + $0x1], 0  ;;  %s1981_s27 = smov 0   ;;  %s1983_s28 = smov 0  }
   0x9   :  { %s1985_s29 = smov 0   ;;  %s1987_s30 = smov 0  }
   0xa LB: > { %s2002_s9 = sadd.s32 4294967295, %s1921_s30   ;;  %s1377_s10 = sadd.s32 4294967294, %s1921_s30   ;;  %s1921_s30 = sphi %s1987_s30, %s2344_s30   ;;  %s1917_s29 = sphi %s1985_s29, %s2343_s29   ;;  %s1913_s28 = sphi %s1983_s28, %s2342_s28   ;;  %s1909_s27 = sphi %s1981_s27, %s2341_s27  }
   0xb   : > { %p47_p0 = scmp.ne.s32.totalorder %s1913_s28, %s1909_s27  ;;  %p2313_p1 = scmp.eq.s32.totalorder %s2002_s9, 0 }
   0xc   : > { %p203_p3 = scmp.eq.s32.totalorder %s1377_s10, 1  ;;  %p1378_p5 = scmp.ge.s32.totalorder %s1921_s30, 1 }
   0xd   : > { %p2011_p4 = por %p2313_p1, %p47_p0  ;;  %p236_p7 = scmp.lt.s32.totalorder %s1921_s30, 3 }
   0xe   : > { %p2016_p6 = por %p203_p3, %p47_p0  ;;  %s1923_s14 = smov [#allocation5]  }
   0xf   : > { %s2321_s11 = scalar_select %p2011_p4, 1, 0 }
  0x10   : > { %s2322_s12 = scalar_select %p2016_p6, 1, 0 }
  0x11   : > { %p2021_p8 = pnand %p1378_p5, %p236_p7  ;;  %s248_s15 = sshll.u32 %s1923_s14, 4  ;;  %s249_s15 = int_to_ptr.vmem [resolvable:$true] %s248_s15 }
  0x12   : > { %s1924_s17 = smov [#allocation8]   ;;  %s1925_s19 = smov [#allocation7]  }
  0x13   : > { %s2323_s13 = scalar_select %p2021_p8, 1, 0 }
  0x14   : > { %p1519_p9 = pneg %p2021_p8  ;;  %s272_s18 = sshll.u32 %s1924_s17, 4  ;;  %s273_s18 = int_to_ptr.vmem [resolvable:$true] %s272_s18 }
  0x15   : > { %s262_s20 = sshll.u32 %s1925_s19, 4  ;;  %s1728_s21 = scalar_lea.vmem %s249_s15, 2048  ;;  %s263_s20 = int_to_ptr.vmem [resolvable:$true] %s262_s20 }
  0x16   : > { %p2030_p11 = pnand %p1519_p9, %p2313_p1  ;;  %p1729_p13 = scmp.ne.s32.totalorder %s249_s15, %s1728_s21 }
  0x17   : > { %p1736_p5 = scmp.lt.s32.totalorder %s249_s15, %s249_s15  ;;  %p1737_p7 = scmp.lt.s32.totalorder %s1728_s21, %s1728_s21 }
  0x18   : > { %p1719_p12 = pneg %p2030_p11 }
  0x19   : > { %p1738_p9 = por %p1737_p7, %p1736_p5 }
  0x1a   : > { %p1731_p0 = pnand %p1729_p13, %p1719_p12 }
  0x1c   : > { %p1732_p3 = pneg %p1731_p0 }
  0x1e   : > { %p1739_p10 = pnand %p1738_p9, %p1732_p3 }
  0x20   : > { %1742 = shalt.err (!%p1739_p10)
}
  0x21   : > { %s2314_s22 = smov 128   ;;  %s2315_s23 = smov 8  }
  0x22   : > { %s2325_s1 = sld [smem:[#allocation16_spill]]  ;;  %s1754_s26 = scalar_lea.vmem %s273_s18, 4096 }
  0x23   : > { %p1755_p13 = scmp.ne.s32.totalorder %s273_s18, %s1754_s26  ;;  %p1762_p3 = scmp.lt.s32.totalorder %s273_s18, %s273_s18 }
  0x24   : > { %p1763_p10 = scmp.lt.s32.totalorder %s1754_s26, %s1754_s26 }
  0x25   : > { %p1757_p0 = pnand %p1755_p13, %p1719_p12 }
  0x26   : > { %p1764_p7 = por %p1763_p10, %p1762_p3 }
  0x27   : > { %p1758_p5 = pneg %p1757_p0 }
  0x28   : > { %1522 = dma.hbm_to_vmem [thread:$0]  (!%p2030_p11), %s2325_s1, 2048, %s249_s15, [#allocation6], %s2314_s22, %s2314_s22, %s2315_s23  }
  0x29   : > { %p1765_p9 = pnand %p1764_p7, %p1758_p5 }
  0x2b   : > { %1768 = shalt.err (!%p1765_p9)
}
  0x2c   : > { %1528 = dma.hbm_to_vmem [thread:$0]  (!%p2030_p11), %s2307_s3, 4096, %s273_s18, [#allocation9], %s2314_s22, %s2314_s22, %s2315_s23  }
  0x2d   : > { %s1780_s15 = scalar_lea.vmem %s263_s20, 32  ;;  %p1788_p3 = scmp.lt.s32.totalorder %s263_s20, %s263_s20 }
  0x2e   : > { %p1781_p1 = scmp.ne.s32.totalorder %s263_s20, %s1780_s15  ;;  %p1789_p5 = scmp.lt.s32.totalorder %s1780_s15, %s1780_s15 }
  0x30   : > { %p1783_p13 = pnand %p1781_p1, %p1719_p12  ;;  %p1790_p10 = por %p1789_p5, %p1788_p3 }
  0x32   : > { %p1784_p0 = pneg %p1783_p13 }
  0x34   : > { %p1791_p7 = pnand %p1790_p10, %p1784_p0 }
  0x36   : > { %1794 = shalt.err (!%p1791_p7)
}
  0x37   : > { %s2326_s2 = sld [smem:[#allocation17_spill]]  ;;  %s1928_s18 = smov [#allocation10]  }
  0x38   : > { %s288_s21 = sshll.u32 %s1928_s18, 4  ;;  %s289_s21 = int_to_ptr.vmem [resolvable:$true] %s288_s21 }
  0x39   : > { %s1806_s24 = scalar_lea.vmem %s289_s21, 2048  ;;  %p1814_p2 = scmp.lt.s32.totalorder %s289_s21, %s289_s21 }
  0x3a   : > { %p1807_p9 = scmp.ne.s32.totalorder %s289_s21, %s1806_s24  ;;  %p1815_p3 = scmp.lt.s32.totalorder %s1806_s24, %s1806_s24 }
  0x3c   : > { %p1809_p1 = pnand %p1807_p9, %p1719_p12  ;;  %p1816_p0 = por %p1815_p3, %p1814_p2 }
  0x3d   : > { %1525 = dma.hbm_to_vmem [thread:$0]  (!%p2030_p11), %s2326_s2, 32, %s263_s20, [#allocation6]  }
  0x3e   : > { %p1810_p13 = pneg %p1809_p1 }
  0x40   : > { %p1817_p5 = pnand %p1816_p0, %p1810_p13 }
  0x42   : > { %1820 = shalt.err (!%p1817_p5)
}
  0x43   : > { %s1929_s25 = smov 64   ;;  %s1930_s20 = smov 4  }
  0x44   : > { %1531 = dma.hbm_to_vmem [thread:$0]  (!%p2030_p11), %s2309_s5, 2048, %s289_s21, [#allocation9], %s1929_s25, %s1929_s25, %s1930_s20  }
  0x45   : > { %s2075_s14 = sadd.s32 1, %s1921_s30   ;;  %s34_s17 = sadd.s32 1, %s1917_s29 }
  0x46   : > { %s31_s15 = ssub.s32 %s1921_s30, %s2075_s14  ;;  %p41_p12 = scmp.ne.s32.totalorder %s1917_s29, %s1913_s28 }
  0x47   : > { %p32_p2 = scmp.eq.s32.totalorder %s31_s15, 0  ;;  %p42_p10 = scmp.eq.s32.totalorder %s1921_s30, 0 }
  0x48   : > { %p2327_p9 = scmp.eq.s32.totalorder %s2002_s9, 1  ;;  %p1544_p13 = scmp.lt.s32.totalorder %s1921_s30, 2 }
  0x49   : > { %s2084_s19 = scalar_select %p32_p2, %s1917_s29, %s34_s17  }
  0x4a   : > { %p43_p7 = por %p42_p10, %p41_p12  ;;  %p2088_p1 = por %p2327_p9, %p41_p12 }
  0x4b   : > { %s305_s16 = sand.u32 1, %s1917_s29   ;;  %s1468_s21 = sshll.u32 %s1921_s30, 8 }
  0x4c   : > { %s2328_s18 = scalar_select %p2088_p1, 1, 0 }
  0x4d   : > { %s1384_s24 = sshll.u32 %s305_s16, 4  ;;  %s2098_s26 = scalar_lea.hbm %s2304_s0, %s1468_s21 }
  0x4e   : > { %s309_s10 = scalar_lea.vmem [#allocation2], %s1384_s24  ;;  %p2102_p11 = pnand %p1544_p13, %p43_p7 }
  0x4f   : > { %s316_s15 = sshll.u32 %s309_s10, 4  ;;  %s2106_s22 = scalar_lea.sflag [#allocation3], %s305_s16  ;;  %s2100_s15 = int_to_ptr.vmem [resolvable:$true] %s316_s15 }
  0x50   : > { %s1821_s23 = scalar_lea.hbm %s2098_s26, 256  ;;  %p1823_p0 = pneg %p2102_p11 }
  0x51   : > { %p1822_p3 = scmp.ne.s32.totalorder %s2098_s26, %s1821_s23  ;;  %s1826_s24 = scalar_lea.hbm %s2304_s0, 512 }
  0x52   : > { %p1827_p12 = scmp.lt.s32.totalorder %s2098_s26, %s2304_s0  ;;  %p1828_p10 = scmp.lt.s32.totalorder %s1826_s24, %s1821_s23 }
  0x53   : > { %p1824_p5 = pnand %p1823_p0, %p1822_p3 }
  0x54   : > { %p1829_p7 = por %p1828_p10, %p1827_p12 }
  0x55   : > { %p1825_p2 = pneg %p1824_p5 }
  0x57   : > { %p1830_p9 = pnand %p1829_p7, %p1825_p2 }
  0x59   : > { %1833 = shalt.err (!%p1830_p9)
}
  0x5a   : > { %s1834_s16 = scalar_lea.vmem %s2100_s15, 256  ;;  %s1931_s1 = smov [#allocation2]  }
  0x5b   : > { %p1835_p13 = scmp.ne.s32.totalorder %s2100_s15, %s1834_s16  ;;  %s1839_s2 = sshll.u32 %s1931_s1, 4  ;;  %s1840_s2 = int_to_ptr.vmem [resolvable:$false] %s1839_s2 }
  0x5c   : > { %s1841_s21 = scalar_lea.vmem %s1840_s2, 512  ;;  %p1842_p5 = scmp.lt.s32.totalorder %s2100_s15, %s1840_s2 }
  0x5d   : > { %p1837_p6 = pnand %p1835_p13, %p1823_p0  ;;  %p1843_p1 = scmp.lt.s32.totalorder %s1841_s21, %s1834_s16 }
  0x5f   : > { %p1838_p3 = pneg %p1837_p6  ;;  %p1844_p4 = por %p1843_p1, %p1842_p5 }
  0x61   : > { %p1845_p8 = pnand %p1844_p4, %p1838_p3 }
  0x63   : > { %1848 = shalt.err (!%p1845_p8)
}
  0x64   : > { %s2330_s23 = smov 8   ;;  %s2331_s25 = smov 128  }
  0x65   : > { %1535 = dma.hbm_to_vmem [thread:$0]  (!%p2102_p11), %s2098_s26, 256, %s2100_s15, %s2106_s22, %s2331_s25, %s2331_s25, %s2330_s23  }
  0x66   : > { %p2332_p6 = scmp.ne.s32.totalorder %s2323_s13, 0 }
  0x67   : > { %s2133_s1 = sand.u32 (!%p2332_p6), 1, %s1913_s28   ;;  %p2333_p4 = scmp.ne.s32.totalorder (!%p2332_p6), %s2321_s11, 0 }
  0x68   : > { %328 = sbr.rel (%p2332_p6) target bundleno = 879 (0x36f), region = 48  ;;  %s1388_s2 = sshll.u32 (!%p2332_p6), %s2133_s1, 4 }
  0x69   : > { %s331_s24 = scalar_lea.sflag (!%p2332_p6), [#allocation3], %s2133_s1  ;;  %s2139_s17 = scalar_lea.vmem (!%p2332_p6), [#allocation2], %s1388_s2 }
  0x6d   : > { %1892 = dma.done.wait (%p2333_p4), %s331_s24, 256  }
  0x6e   : > { %1894 = vsyncadd (%p2333_p4), %s331_s24, 4294967040  ;;  %p2334_p8 = scmp.eq.s32.totalorder %s2002_s9, 0 }
  0x70   : > { %1896 = dma.done.wait (%p2334_p8), [#allocation6], 2080   ;;  %p2335_p1 = pmov %p2334_p8 }
  0x72   : > { %1898 = vsyncadd (%p2335_p1), [#allocation6], 4294965216  ;;  %p2336_p11 = pmov %p2335_p1 }
  0x73   : > { %p2337_p0 = pmov %p2335_p1 }
  0x74   : > { %1900 = dma.done.wait (%p2336_p11), [#allocation9], 6144  }
  0x75   : > { %1902 = vsyncadd (%p2337_p0), [#allocation9], 4294961152  ;;  %v1932_v0 = vmov 0   ;;  %v1593_v1 = vld [vmem:[#allocation5 + $0x74] ss:$8 sps:$4 sm:$0xff]   ;;  %v440_v52 = vlaneseq  ;;  %s1394_s22 = sshll.u32 %s2002_s9, 1 }
  0x76   : > { %562 = vmatprep.mubr.bf16.mxu0 %v1932_v0  ;;  %v1595_v2 = vld [vmem:[#allocation5 + $0x70] ss:$8 sps:$4 sm:$0xff]   ;;  %530 = vmatprep.subr.bf16.mxu0 %v1593_v1  ;;  %v1596_v3 = vld [vmem:[#allocation5 + $0x64] ss:$8 sps:$4 sm:$0xff]   ;;  %v1598_v4 = vld [vmem:[#allocation5 + $0x60] ss:$8 sps:$4 sm:$0xff]  }
  0x77   : > { %531 = vmatpush1.bf16.msra.mxu0 %v1595_v2  ;;  %v1599_v5 = vld [vmem:[#allocation5 + $0x54] ss:$8 sps:$4 sm:$0xff]   ;;  %v1601_v6 = vld [vmem:[#allocation5 + $0x50] ss:$8 sps:$4 sm:$0xff]   ;;  %v1602_v7 = vld [vmem:[#allocation5 + $0x44] ss:$8 sps:$4 sm:$0xff]  }
  0x78   : > { %532 = vmatprep.subr.bf16.mxu0 %v1596_v3  ;;  %v1604_v8 = vld [vmem:[#allocation5 + $0x40] ss:$8 sps:$4 sm:$0xff]   ;;  %v1605_v9 = vld [vmem:[#allocation5 + $0x34] ss:$8 sps:$4 sm:$0xff]   ;;  %v1607_v11 = vld [vmem:[#allocation5 + $0x30] ss:$8 sps:$4 sm:$0xff]  }
  0x79   : > { %v1617_v10 = vld [vmem:[#allocation8 + $0x74] ss:$8 sps:$4 sm:$0xff]   ;;  %v1608_v12 = vld [vmem:[#allocation5 + $0x24] ss:$8 sps:$4 sm:$0xff]   ;;  %v1619_v21 = vld [vmem:[#allocation8 + $0x70] ss:$8 sps:$4 sm:$0xff]  }
  0x7a   : > { %887 = vmatprep.subr.bf16.mxu1 %v1617_v10  ;;  %v1610_v13 = vld [vmem:[#allocation5 + $0x20] ss:$8 sps:$4 sm:$0xff]   ;;  %v1611_v14 = vld [vmem:[#allocation5 + $0x14] ss:$8 sps:$4 sm:$0xff]   ;;  %v1613_v15 = vld [vmem:[#allocation5 + $0x10] ss:$8 sps:$4 sm:$0xff]  }
  0x7b   : > { %533 = vmatpush1.bf16.msra.mxu0 %v1598_v4  ;;  %v1614_v16 = vld [vmem:[#allocation5 + $0x4] ss:$8 sps:$4 sm:$0xff]   ;;  %v1616_v17 = vld [vmem:[#allocation5] ss:$8 sps:$4 sm:$0xff]   ;;  %888 = vmatpush1.bf16.msra.mxu1 %v1619_v21  ;;  %v1625_v25 = vld [vmem:[#allocation8 + $0x50] ss:$8 sps:$4 sm:$0xff]  }
  0x7c   : > { %534 = vmatprep.subr.bf16.mxu0 %v1599_v5  ;;  %v2154_v18 = vld [vmem:[%s2139_s17] sm:$0xff]  ;;  %v2157_v19 = vld [vmem:[%s2139_s17 + $0x8] sm:$0xff]  ;;  %v2161_v53 = vshrl.u32 %v440_v52, 7  ;;  %p391_p2 = scmp.lt.s32.totalorder %s1394_s22, 3  ;;  %s380_s23 = scalar_lea.vmem [#allocation11], %s1388_s2 }
  0x7d   : > { %v421_v20 = vpack.c.bf16 %v2157_v19, %v2154_v18  ;;  %v1620_v22 = vld [vmem:[#allocation8 + $0x64] ss:$8 sps:$4 sm:$0xff]   ;;  %v1622_v23 = vld [vmem:[#allocation8 + $0x60] ss:$8 sps:$4 sm:$0xff]   ;;  %v1623_v24 = vld [vmem:[#allocation8 + $0x54] ss:$8 sps:$4 sm:$0xff]  }
  0x7e   : > { %889 = vmatprep.subr.bf16.mxu1 %v1620_v22  ;;  %v1626_v26 = vld [vmem:[#allocation8 + $0x44] ss:$8 sps:$4 sm:$0xff]   ;;  %v1628_v27 = vld [vmem:[#allocation8 + $0x40] ss:$8 sps:$4 sm:$0xff]   ;;  %v1629_v28 = vld [vmem:[#allocation8 + $0x34] ss:$8 sps:$4 sm:$0xff]  }
  0x7f   : > { %535 = vmatpush1.bf16.msra.mxu0 %v1601_v6  ;;  %890 = vmatpush1.bf16.msra.mxu1 %v1622_v23  ;;  %v1631_v29 = vld [vmem:[#allocation8 + $0x30] ss:$8 sps:$4 sm:$0xff]   ;;  %v1632_v30 = vld [vmem:[#allocation8 + $0x24] ss:$8 sps:$4 sm:$0xff]   ;;  %v1634_v31 = vld [vmem:[#allocation8 + $0x20] ss:$8 sps:$4 sm:$0xff]  }
  0x80   : > { %536 = vmatprep.subr.bf16.mxu0 %v1602_v7  ;;  %891 = vmatprep.subr.bf16.mxu1 %v1623_v24  ;;  %v1635_v32 = vld [vmem:[#allocation8 + $0x14] ss:$8 sps:$4 sm:$0xff]   ;;  %v1637_v33 = vld [vmem:[#allocation8 + $0x10] ss:$8 sps:$4 sm:$0xff]   ;;  %v1638_v34 = vld [vmem:[#allocation8 + $0x4] ss:$8 sps:$4 sm:$0xff]  }
  0x81   : > { %v1640_v35 = vld [vmem:[#allocation8] ss:$8 sps:$4 sm:$0xff]   ;;  %v1641_v36 = vld [vmem:[#allocation8 + $0xf4] ss:$8 sps:$4 sm:$0xff]   ;;  %v1643_v37 = vld [vmem:[#allocation8 + $0xf0] ss:$8 sps:$4 sm:$0xff]  }
  0x82   : > { %v1644_v38 = vld [vmem:[#allocation8 + $0xe4] ss:$8 sps:$4 sm:$0xff]   ;;  %v1646_v39 = vld [vmem:[#allocation8 + $0xe0] ss:$8 sps:$4 sm:$0xff]   ;;  %v1647_v40 = vld [vmem:[#allocation8 + $0xd4] ss:$8 sps:$4 sm:$0xff]  }
  0x83   : > { %537 = vmatpush1.bf16.msra.mxu0 %v1604_v8  ;;  %892 = vmatpush1.bf16.msra.mxu1 %v1625_v25  ;;  %v1649_v41 = vld [vmem:[#allocation8 + $0xd0] ss:$8 sps:$4 sm:$0xff]   ;;  %v1650_v42 = vld [vmem:[#allocation8 + $0xc4] ss:$8 sps:$4 sm:$0xff]   ;;  %v1652_v43 = vld [vmem:[#allocation8 + $0xc0] ss:$8 sps:$4 sm:$0xff]  }
  0x84   : > { %538 = vmatprep.subr.bf16.mxu0 %v1605_v9  ;;  %893 = vmatprep.subr.bf16.mxu1 %v1626_v26  ;;  %v1653_v44 = vld [vmem:[#allocation8 + $0xb4] ss:$8 sps:$4 sm:$0xff]   ;;  %v1655_v45 = vld [vmem:[#allocation8 + $0xb0] ss:$8 sps:$4 sm:$0xff]   ;;  %v1656_v46 = vld [vmem:[#allocation8 + $0xa4] ss:$8 sps:$4 sm:$0xff]  }
  0x85   : > { %v1658_v47 = vld [vmem:[#allocation8 + $0xa0] ss:$8 sps:$4 sm:$0xff]   ;;  %v1659_v48 = vld [vmem:[#allocation8 + $0x94] ss:$8 sps:$4 sm:$0xff]   ;;  %v1661_v49 = vld [vmem:[#allocation8 + $0x90] ss:$8 sps:$4 sm:$0xff]  }
  0x86   : > { %v1662_v50 = vld [vmem:[#allocation8 + $0x84] ss:$8 sps:$4 sm:$0xff]   ;;  %v1664_v51 = vld [vmem:[#allocation8 + $0x80] ss:$8 sps:$4 sm:$0xff]   ;;  %v442_v54 = vsub.s32 0, %v2161_v53  ;;  %v446_v56 = vsub.s32 1, %v2161_v53 }
  0x87   : > { %539 = vmatpush1.bf16.msra.mxu0 %v1607_v11  ;;  %894 = vmatpush1.bf16.msra.mxu1 %v1628_v27  ;;  %v438_v55 = vld [vmem:[#allocation7] sm:$0x3]  ;;  %s2346_s22 = smov (!%p391_p2, %s1394_s22), 3  ;;  %s1237_s25 = sshll.u32 %s380_s23, 4  ;;  %s2256_s25 = int_to_ptr.vmem [resolvable:$true] %s1237_s25 }
  0x88   : > { %540 = vmatprep.subr.bf16.mxu0 %v1608_v12  ;;  %895 = vmatprep.subr.bf16.mxu1 %v1629_v28  ;;  %v443_v57 = vrot.slane %v438_v55, %v442_v54  ;;  %v447_v58 = vrot.slane %v438_v55, %v446_v56  ;;  %s1395_s26 = sshll.u32 %s2346_s22, 2  ;;  %s1471_s24 = sshll.u32 %s2002_s9, 8 }
  0x89   : > { %s394_s10 = scalar_lea.vmem %s2312_s8, %s1395_s26  ;;  %s2261_s13 = scalar_lea.hbm %s2311_s7, %s1471_s24 }
  0x8a   : > { %s1219_s2 = scalar_lea.sflag [#allocation4], %s2133_s1  ;;  %s1849_s22 = scalar_lea.vmem %s2256_s25, 256 }
  0x8b   : > { %541 = vmatpush1.bf16.msra.mxu0 %v1610_v13  ;;  %896 = vmatpush1.bf16.msra.mxu1 %v1631_v29  ;;  %p1850_p12 = scmp.ne.s32.totalorder %s2256_s25, %s1849_s22  ;;  %p2338_p10 = scmp.ne.s32.totalorder %s2328_s18, 0 }
  0x8c   : > { %542 = vmatprep.subr.bf16.mxu0 %v1611_v14  ;;  %897 = vmatprep.subr.bf16.mxu1 %v1632_v30  ;;  %s1933_s9 = smov [#allocation11]  }
  0x8d   : > { %p1851_p7 = pnand %p1850_p12, %p2338_p10  ;;  %s1853_s26 = sshll.u32 %s1933_s9, 4  ;;  %s1854_s26 = int_to_ptr.vmem [resolvable:$false] %s1853_s26 }
  0x8e   : > { %s1855_s15 = scalar_lea.vmem %s1854_s26, 512  ;;  %p1856_p13 = scmp.lt.s32.totalorder %s2256_s25, %s1854_s26 }
  0x8f   : > { %543 = vmatpush1.bf16.msra.mxu0 %v1613_v15  ;;  %898 = vmatpush1.bf16.msra.mxu1 %v1634_v31  ;;  %p1852_p9 = pneg %p1851_p7  ;;  %p1857_p3 = scmp.lt.s32.totalorder %s1855_s15, %s1849_s22 }
  0x90   : > { %544 = vmatprep.subr.bf16.mxu0 %v1614_v16  ;;  %899 = vmatprep.subr.bf16.mxu1 %v1635_v32 }
  0x91   : > { %p1858_p5 = por %p1857_p3, %p1856_p13 }
  0x93   : > { %545 = vmatpush1.bf16.msra.mxu0 %v1616_v17  ;;  %900 = vmatpush1.bf16.msra.mxu1 %v1637_v33  ;;  %p1859_p6 = pnand %p1858_p5, %p1852_p9 }
  0x94   : > { %901 = vmatprep.subr.bf16.mxu1 %v1638_v34 }
  0x96   : > { %563 = vmatmul.mubr.bf16.vlgmr.msra.gmra.mxu0 %v421_v20 }
  0x97   : > { %902 = vmatpush1.bf16.msra.mxu1 %v1640_v35 }
  0x98   : > { %903 = vmatprep.subr.bf16.mxu1 %v1641_v36 }
  0x9b   : > { %904 = vmatpush2.bf16.msra.mxu1 %v1643_v37 }
  0x9c   : > { %905 = vmatprep.subr.bf16.mxu1 %v1644_v38 }
  0x9f   : > { %906 = vmatpush2.bf16.msra.mxu1 %v1646_v39 }
  0xa0   : > { %907 = vmatprep.subr.bf16.mxu1 %v1647_v40 }
  0xa3   : > { %908 = vmatpush2.bf16.msra.mxu1 %v1649_v41 }
  0xa4   : > { %909 = vmatprep.subr.bf16.mxu1 %v1650_v42 }
  0xa7   : > { %910 = vmatpush2.bf16.msra.mxu1 %v1652_v43 }
  0xa8   : > { %911 = vmatprep.subr.bf16.mxu1 %v1653_v44 }
  0xab   : > { %912 = vmatpush2.bf16.msra.mxu1 %v1655_v45 }
  0xac   : > { %913 = vmatprep.subr.bf16.mxu1 %v1656_v46 }
  0xaf   : > { %914 = vmatpush2.bf16.msra.mxu1 %v1658_v47 }
  0xb0   : > { %915 = vmatprep.subr.bf16.mxu1 %v1659_v48 }
  0xb3   : > { %916 = vmatpush2.bf16.msra.mxu1 %v1661_v49 }
  0xb4   : > { %917 = vmatprep.subr.bf16.mxu1 %v1662_v50 }
  0xb7   : > { %918 = vmatpush2.bf16.msra.mxu1 %v1664_v51 }
 0x156   : > { %v564_v59 = vpop.f32.mrf.mxu0 }
 0x157   : > { %v2169_v60 = vadd.f32 %v564_v59, %v443_v57 }
 0x158   : > { %v566_v61 = vpop.f32.mrf.mxu0 }
 0x159   : > { %v2172_v62 = vmul.f32 0.70710677, %v2169_v60  ;;  %v2174_v63 = vadd.f32 %v566_v61, %v447_v58 }
 0x15a   : > { %v568_v0 = vpop.f32.mrf.mxu0 }
 0x15b   : > { %v581_v1 = vand.u32 2147483647, %v2172_v62  ;;  %v2178_v2 = vmul.f32 0.70710677, %v2174_v63  ;;  %v2180_v3 = vadd.f32 %v568_v0, %v443_v57  ;;  %vm661_vm1 = vcmp.ge.f32.partialorder %v2172_v62, 0.0 }
 0x15c   : > { %v570_v4 = vpop.f32.mrf.mxu0 }
 0x15d   : > { %v585_v5 = vmul.f32 0.3275911, %v581_v1  ;;  %v582_v6 = vand.u32 2147483647, %v2178_v2  ;;  %v2184_v7 = vmul.f32 0.70710677, %v2180_v3  ;;  %v2186_v8 = vadd.f32 %v570_v4, %v447_v58 }
 0x15e   : > { %v637_v21 = vsub.f32 0.0, %v581_v1  ;;  %vm662_vm0 = vcmp.ge.f32.partialorder %v2178_v2, 0.0  ;;  %v574_v2 = vmul.f32 0.5, %v2174_v63  ;;  %v1669_v63 = vld [vmem:[#allocation10 + $0x68] sm:$0xff]  }
 0x15f   : > { %v589_v9 = vadd.f32 1.0, %v585_v5  ;;  %v586_v10 = vmul.f32 0.3275911, %v582_v6  ;;  %v583_v11 = vand.u32 2147483647, %v2184_v7  ;;  %v638_v22 = vsub.f32 0.0, %v582_v6 }
 0x160   : > { %v2190_v12 = vmul.f32 0.70710677, %v2186_v8  ;;  %v641_v23 = vmul.f32 %v637_v21, %v581_v1  ;;  %vm663_vm2 = vcmp.ge.f32.partialorder %v2184_v7, 0.0  ;;  %v573_v7 = vmul.f32 0.5, %v2169_v60  ;;  %v1671_v60 = vld [vmem:[#allocation10 + $0x60] sm:$0xff]  }
 0x161   : > { %1681 = vrcp.f32 %v589_v9  ;;  %v590_v13 = vadd.f32 1.0, %v586_v10  ;;  %v587_v14 = vmul.f32 0.3275911, %v583_v11  ;;  %v639_v24 = vsub.f32 0.0, %v583_v11 }
 0x162   : > { %v584_v15 = vand.u32 2147483647, %v2190_v12  ;;  %v642_v26 = vmul.f32 %v638_v22, %v582_v6  ;;  %v645_v28 = vmul.f32 1.442695, %v641_v23  ;;  %vm664_vm3 = vcmp.ge.f32.partialorder %v2190_v12, 0.0  ;;  %v1665_v12 = vld [vmem:[#allocation10 + $0x78] sm:$0xff]  }
 0x163   : > { %1683 = vrcp.f32 %v590_v13  ;;  %v591_v16 = vadd.f32 1.0, %v587_v14  ;;  %v643_v30 = vmul.f32 %v639_v24, %v583_v11  ;;  %1477 = vmatprep.subr.bf16.mxu0 %v1665_v12 }
 0x164   : > { %v588_v17 = vmul.f32 0.3275911, %v584_v15  ;;  %v640_v29 = vsub.f32 0.0, %v584_v15  ;;  %v647_v33 = vmul.f32 1.442695, %v642_v26 }
 0x165   : > { %1685 = vrcp.f32 %v591_v16  ;;  %v649_v39 = vmul.f32 1.442695, %v643_v30 }
 0x166   : > { %v592_v20 = vadd.f32 1.0, %v588_v17  ;;  %v644_v37 = vmul.f32 %v640_v29, %v584_v15 }
 0x168   : > { %1687 = vrcp.f32 %v592_v20  ;;  %v651_v46 = vmul.f32 1.442695, %v644_v37 }
 0x169   : > { %1689 = vpow2.f32 %v645_v28 }
 0x16a   : > { %1691 = vpow2.f32 %v647_v33 }
 0x16b   : > { %1693 = vpow2.f32 %v649_v39 }
 0x16c   : > { %1695 = vpow2.f32 %v651_v46  ;;  %v576_v46 = vmul.f32 0.5, %v2186_v8  ;;  %v1670_v8 = vld [vmem:[#allocation10 + $0x28] sm:$0xff]  }
 0x16e   : > { %v1682_v25 = vpop.eup %1681 }
 0x16f   : > { %v601_v27 = vmul.f32 1.0614054, %v1682_v25 }
 0x170   : > { %v1684_v31 = vpop.eup %1683 }
 0x171   : > { %v605_v32 = vadd.f32 -1.4531521, %v601_v27  ;;  %v602_v34 = vmul.f32 1.0614054, %v1684_v31 }
 0x172   : > { %v1686_v35 = vpop.eup %1685 }
 0x173   : > { %v609_v36 = vmul.f32 %v1682_v25, %v605_v32  ;;  %v603_v38 = vmul.f32 1.0614054, %v1686_v35  ;;  %v606_v40 = vadd.f32 -1.4531521, %v602_v34 }
 0x175   : > { %v613_v41 = vadd.f32 1.4214138, %v609_v36  ;;  %v1688_v42 = vpop.eup %1687  ;;  %v607_v43 = vadd.f32 -1.4531521, %v603_v38  ;;  %v610_v44 = vmul.f32 %v1684_v31, %v606_v40 }
 0x176   : > { %v604_v47 = vmul.f32 1.0614054, %v1688_v42  ;;  %v1690_v10 = vpop.eup %1689 }
 0x177   : > { %v617_v45 = vmul.f32 %v1682_v25, %v613_v41  ;;  %v611_v48 = vmul.f32 %v1686_v35, %v607_v43  ;;  %v614_v49 = vadd.f32 1.4214138, %v610_v44  ;;  %v1692_v20 = vpop.eup %1691  ;;  %v575_v44 = vmul.f32 0.5, %v2180_v3  ;;  %v1667_v3 = vld [vmem:[#allocation10 + $0x70] sm:$0xff]  }
 0x178   : > { %v608_v51 = vadd.f32 -1.4531521, %v604_v47  ;;  %v1694_v26 = vpop.eup %1693 }
 0x179   : > { %v621_v50 = vadd.f32 -0.28449672, %v617_v45  ;;  %v615_v52 = vadd.f32 1.4214138, %v611_v48  ;;  %v618_v55 = vmul.f32 %v1684_v31, %v614_v49  ;;  %v1696_v32 = vpop.eup %1695 }
 0x17a   : > { %v612_v58 = vmul.f32 %v1688_v42, %v608_v51 }
 0x17b   : > { %v625_v57 = vmul.f32 %v1682_v25, %v621_v50  ;;  %v619_v59 = vmul.f32 %v1686_v35, %v615_v52  ;;  %v622_v61 = vadd.f32 -0.28449672, %v618_v55  ;;  %v1666_v55 = vld [vmem:[#allocation10 + $0x38] sm:$0xff]  }
 0x17c   : > { %v616_v1 = vadd.f32 1.4214138, %v612_v58  ;;  %1478 = vmatpush3.bf16.msra.mxu0 %v1666_v55  ;;  %v1672_v58 = vld [vmem:[#allocation10 + $0x20] sm:$0xff]  }
 0x17d   : > { %v629_v0 = vadd.f32 0.2548296, %v625_v57  ;;  %v623_v4 = vadd.f32 -0.28449672, %v619_v59  ;;  %v626_v5 = vmul.f32 %v1684_v31, %v622_v61  ;;  %v1668_v57 = vld [vmem:[#allocation10 + $0x30] sm:$0xff]   ;;  %1479 = vmatprep.subr.bf16.mxu0 %v1667_v3  ;;  %v1673_v59 = vld [vmem:[#allocation10 + $0x58] sm:$0xff]  }
 0x17e   : > { %v620_v9 = vmul.f32 %v1688_v42, %v616_v1  ;;  %v1674_v61 = vld [vmem:[#allocation10 + $0x18] sm:$0xff]   ;;  %v1676_v1 = vld [vmem:[#allocation10 + $0x10] sm:$0xff]  }
 0x17f   : > { %v633_v6 = vmul.f32 %v1682_v25, %v629_v0  ;;  %v627_v11 = vmul.f32 %v1686_v35, %v623_v4  ;;  %v630_v13 = vadd.f32 0.2548296, %v626_v5  ;;  %v1675_v0 = vld [vmem:[#allocation10 + $0x50] sm:$0xff]   ;;  %v1677_v4 = vld [vmem:[#allocation10 + $0x48] sm:$0xff]  }
 0x180   : > { %v624_v15 = vadd.f32 -0.28449672, %v620_v9  ;;  %1480 = vmatpush3.bf16.msra.mxu0 %v1668_v57  ;;  %v1678_v5 = vld [vmem:[#allocation10 + $0x8] sm:$0xff]   ;;  %v1680_v9 = vld [vmem:[#allocation10] sm:$0xff]  }
 0x181   : > { %v653_v14 = vmul.f32 %v1690_v10, %v633_v6  ;;  %v631_v16 = vadd.f32 0.2548296, %v627_v11  ;;  %v634_v17 = vmul.f32 %v1684_v31, %v630_v13  ;;  %1481 = vmatprep.subr.bf16.mxu0 %v1669_v63  ;;  %v1679_v6 = vld [vmem:[#allocation10 + $0x40] sm:$0xff]   ;;  %v399_v10 = vmul.f32 %v2154_v18, %v2154_v18  ;;  %v715_v13 = vld [vmem:[%s2308_s4] sm:$0x3] }
 0x182   : > { %v628_v21 = vmul.f32 %v1688_v42, %v624_v15  ;;  %v400_v11 = vmul.f32 %v2157_v19, %v2157_v19  ;;  %v724_v15 = vrot.slane %v715_v13, %v446_v56 }
 0x183   : > { %v657_v22 = vsub.f32 1.0, %v653_v14  ;;  %v635_v23 = vmul.f32 %v1686_v35, %v631_v16  ;;  %v654_v24 = vmul.f32 %v1692_v20, %v634_v17  ;;  %401 = vadd.xlane.f32.xlu0 %v399_v10  ;;  %v720_v14 = vrot.slane %v715_v13, %v442_v54 }
 0x184   : > { %v632_v27 = vadd.f32 0.2548296, %v628_v21  ;;  %1482 = vmatpush3.bf16.msra.mxu0 %v1670_v8 }
 0x185   : > { %v655_v28 = vmul.f32 %v1694_v26, %v635_v23  ;;  %v658_v29 = vsub.f32 1.0, %v654_v24  ;;  %v665_v25 = vsub.f32 0.0, %v657_v22  ;;  %1483 = vmatprep.subr.bf16.mxu0 %v1671_v60 }
 0x186   : > { %v636_v30 = vmul.f32 %v1688_v42, %v632_v27 }
 0x187   : > { %v659_v33 = vsub.f32 1.0, %v655_v28  ;;  %v666_v34 = vsub.f32 0.0, %v658_v29  ;;  %v669_v38 = vsel %vm661_vm1, %v657_v22, %v665_v25  ;;  %403 = vadd.xlane.f32.xlu0 %v400_v11 }
 0x188   : > { %v656_v36 = vmul.f32 %v1696_v32, %v636_v30  ;;  %v673_v43 = vadd.f32 1.0, %v669_v38  ;;  %1484 = vmatpush3.bf16.msra.mxu0 %v1672_v58 }
 0x189   : > { %v667_v37 = vsub.f32 0.0, %v659_v33  ;;  %v670_v35 = vsel %vm662_vm0, %v658_v29, %v666_v34  ;;  %1485 = vmatprep.subr.bf16.mxu0 %v1673_v59 }
 0x18a   : > { %v660_v31 = vsub.f32 1.0, %v656_v36  ;;  %v674_v42 = vadd.f32 1.0, %v670_v35  ;;  %v677_v50 = vmul.f32 %v673_v43, %v573_v7 }
 0x18b   : > { %v671_v39 = vsel %vm663_vm2, %v659_v33, %v667_v37 }
 0x18c   : > { %v675_v40 = vadd.f32 1.0, %v671_v39  ;;  %v668_v41 = vsub.f32 0.0, %v660_v31  ;;  %v678_v48 = vmul.f32 %v674_v42, %v574_v2  ;;  %1486 = vmatpush3.bf16.msra.mxu0 %v1674_v61 }
 0x18d   : > { %1487 = vmatprep.subr.bf16.mxu0 %v1675_v0 }
 0x18e   : > { %v672_v45 = vsel %vm664_vm3, %v660_v31, %v668_v41  ;;  %v679_v47 = vmul.f32 %v675_v40, %v575_v44 }
 0x18f   : > { %v676_v62 = vadd.f32 1.0, %v672_v45 }
 0x190   : > { %v681_v52 = vpack.c.bf16 %v679_v47, %v677_v50  ;;  %1488 = vmatpush3.bf16.msra.mxu0 %v1676_v1 }
 0x191   : > { %v680_v49 = vmul.f32 %v676_v62, %v576_v46  ;;  %1489 = vmatprep.subr.bf16.mxu0 %v1677_v4 }
 0x193   : > { %v682_v51 = vpack.c.bf16 %v680_v49, %v678_v48 }
 0x194   : > { %1490 = vmatpush3.bf16.msra.mxu0 %v1678_v5 }
 0x195   : > { %919 = vmatprep.mubr.bf16.mxu1 %v682_v51  ;;  %1491 = vmatprep.subr.bf16.mxu0 %v1679_v6 }
 0x196   : > { %920 = vmatmul.mubr.bf16.vlgmr.msra.gmra.mxu1 %v681_v52 }
 0x198   : > { %1492 = vmatpush3.bf16.msra.mxu0 %v1680_v9 }
 0x256   : > { %v921_v16 = vpop.f32.mrf.mxu1 }
 0x257   : > { %v2212_v17 = vadd.f32 %v921_v16, %v720_v14 }
 0x258   : > { %v923_v20 = vpop.f32.mrf.mxu1 }
 0x259   : > { %v2215_v21 = vmul.f32 0.70710677, %v2212_v17  ;;  %v2217_v22 = vadd.f32 %v923_v20, %v724_v15 }
 0x25a   : > { %v925_v23 = vpop.f32.mrf.mxu1 }
 0x25b   : > { %v938_v24 = vand.u32 2147483647, %v2215_v21  ;;  %v2221_v26 = vmul.f32 0.70710677, %v2217_v22  ;;  %v2223_v27 = vadd.f32 %v925_v23, %v720_v14  ;;  %vm1018_vm5 = vcmp.ge.f32.partialorder %v2215_v21, 0.0 }
 0x25c   : > { %v927_v54 = vpop.f32.mrf.mxu1 }
 0x25d   : > { %v942_v53 = vmul.f32 0.3275911, %v938_v24  ;;  %v939_v56 = vand.u32 2147483647, %v2221_v26  ;;  %v2227_v28 = vmul.f32 0.70710677, %v2223_v27  ;;  %v2229_v29 = vadd.f32 %v927_v54, %v724_v15 }
 0x25e   : > { %v994_v39 = vsub.f32 0.0, %v938_v24  ;;  %vm1019_vm4 = vcmp.ge.f32.partialorder %v2221_v26, 0.0  ;;  %v931_v26 = vmul.f32 0.5, %v2217_v22 }
 0x25f   : > { %v946_v30 = vadd.f32 1.0, %v942_v53  ;;  %v943_v32 = vmul.f32 0.3275911, %v939_v56  ;;  %v940_v25 = vand.u32 2147483647, %v2227_v28  ;;  %v995_v40 = vsub.f32 0.0, %v939_v56 }
 0x260   : > { %v2233_v33 = vmul.f32 0.70710677, %v2229_v29  ;;  %v998_v41 = vmul.f32 %v994_v39, %v938_v24  ;;  %vm1020_vm6 = vcmp.ge.f32.partialorder %v2227_v28, 0.0  ;;  %v930_v28 = vmul.f32 0.5, %v2212_v17 }
 0x261   : > { %1697 = vrcp.f32 %v946_v30  ;;  %v947_v34 = vadd.f32 1.0, %v943_v32  ;;  %v944_v36 = vmul.f32 0.3275911, %v940_v25  ;;  %v996_v42 = vsub.f32 0.0, %v940_v25 }
 0x262   : > { %v941_v37 = vand.u32 2147483647, %v2233_v33  ;;  %v999_v44 = vmul.f32 %v995_v40, %v939_v56  ;;  %v1002_v2 = vmul.f32 1.442695, %v998_v41  ;;  %vm1021_vm7 = vcmp.ge.f32.partialorder %v2233_v33, 0.0  ;;  %v402_v33 = vpop.xlane.xlu0 %401 }
 0x263   : > { %1699 = vrcp.f32 %v947_v34  ;;  %v948_v31 = vadd.f32 1.0, %v944_v36  ;;  %v1000_v62 = vmul.f32 %v996_v42, %v940_v25 }
 0x264   : > { %v945_v35 = vmul.f32 0.3275911, %v941_v37  ;;  %v997_v46 = vsub.f32 0.0, %v941_v37  ;;  %v1004_v49 = vmul.f32 1.442695, %v999_v44 }
 0x265   : > { %1701 = vrcp.f32 %v948_v31  ;;  %v1006_v3 = vmul.f32 1.442695, %v1000_v62 }
 0x266   : > { %v949_v38 = vadd.f32 1.0, %v945_v35  ;;  %v1001_v52 = vmul.f32 %v997_v46, %v941_v37 }
 0x268   : > { %1703 = vrcp.f32 %v949_v38  ;;  %v1008_v61 = vmul.f32 1.442695, %v1001_v52 }
 0x269   : > { %1705 = vpow2.f32 %v1002_v2 }
 0x26a   : > { %1707 = vpow2.f32 %v1004_v49 }
 0x26b   : > { %1709 = vpow2.f32 %v1006_v3 }
 0x26c   : > { %1711 = vpow2.f32 %v1008_v61 }
 0x26e   : > { %v1698_v43 = vpop.eup %1697 }
 0x26f   : > { %v958_v45 = vmul.f32 1.0614054, %v1698_v43 }
 0x270   : > { %v1700_v7 = vpop.eup %1699 }
 0x271   : > { %v962_v47 = vadd.f32 -1.4531521, %v958_v45  ;;  %v959_v48 = vmul.f32 1.0614054, %v1700_v7 }
 0x272   : > { %v1702_v50 = vpop.eup %1701 }
 0x273   : > { %v966_v51 = vmul.f32 %v1698_v43, %v962_v47  ;;  %v963_v12 = vadd.f32 -1.4531521, %v959_v48  ;;  %v960_v55 = vmul.f32 1.0614054, %v1702_v50 }
 0x275   : > { %v970_v57 = vadd.f32 1.4214138, %v966_v51  ;;  %v1704_v63 = vpop.eup %1703  ;;  %v967_v8 = vmul.f32 %v1700_v7, %v963_v12  ;;  %v964_v60 = vadd.f32 -1.4531521, %v960_v55 }
 0x276   : > { %v961_v59 = vmul.f32 1.0614054, %v1704_v63  ;;  %v1706_v53 = vpop.eup %1705 }
 0x277   : > { %v974_v58 = vmul.f32 %v1698_v43, %v970_v57  ;;  %v971_v0 = vadd.f32 1.4214138, %v967_v8  ;;  %v968_v1 = vmul.f32 %v1702_v50, %v964_v60  ;;  %v1708_v37 = vpop.eup %1707  ;;  %v932_v57 = vmul.f32 0.5, %v2223_v27  ;;  %v404_v27 = vpop.xlane.xlu0 %403 }
 0x278   : > { %v965_v5 = vadd.f32 -1.4531521, %v961_v59  ;;  %v1710_v40 = vpop.eup %1709  ;;  %v933_v8 = vmul.f32 0.5, %v2229_v29 }
 0x279   : > { %v978_v4 = vadd.f32 -0.28449672, %v974_v58  ;;  %v975_v6 = vmul.f32 %v1700_v7, %v971_v0  ;;  %v972_v9 = vadd.f32 1.4214138, %v968_v1  ;;  %v1712_v2 = vpop.eup %1711 }
 0x27a   : > { %v969_v11 = vmul.f32 %v1704_v63, %v965_v5  ;;  %v406_v5 = vmax.f32 %v404_v27, 1e-24 }
 0x27b   : > { %v982_v10 = vmul.f32 %v1698_v43, %v978_v4  ;;  %v979_v13 = vadd.f32 -0.28449672, %v975_v6  ;;  %v976_v14 = vmul.f32 %v1702_v50, %v972_v9  ;;  %v405_v4 = vmax.f32 %v402_v33, 1e-24 }
 0x27c   : > { %v973_v16 = vadd.f32 1.4214138, %v969_v11  ;;  %v1446_v11 = vld [vmem:[%s2310_s6] ss:$0 sm:$0xff] }
 0x27d   : > { %v986_v15 = vadd.f32 0.2548296, %v982_v10  ;;  %v983_v20 = vmul.f32 %v1700_v7, %v979_v13  ;;  %v980_v23 = vadd.f32 -0.28449672, %v976_v14  ;;  %1713 = vrsqrt.f32 %v405_v4 }
 0x27e   : > { %v977_v54 = vmul.f32 %v1704_v63, %v973_v16  ;;  %1715 = vrsqrt.f32 %v406_v5 }
 0x27f   : > { %v990_v24 = vmul.f32 %v1698_v43, %v986_v15  ;;  %v987_v56 = vadd.f32 0.2548296, %v983_v20  ;;  %v984_v30 = vmul.f32 %v1702_v50, %v980_v23 }
 0x280   : > { %v981_v25 = vadd.f32 -0.28449672, %v977_v54 }
 0x281   : > { %v1010_v32 = vmul.f32 %v1706_v53, %v990_v24  ;;  %v991_v34 = vmul.f32 %v1700_v7, %v987_v56  ;;  %v988_v36 = vadd.f32 0.2548296, %v984_v30 }
 0x282   : > { %v985_v31 = vmul.f32 %v1704_v63, %v981_v25 }
 0x283   : > { %v1014_v35 = vsub.f32 1.0, %v1010_v32  ;;  %v1011_v38 = vmul.f32 %v1708_v37, %v991_v34  ;;  %v992_v39 = vmul.f32 %v1702_v50, %v988_v36 }
 0x284   : > { %v989_v41 = vadd.f32 0.2548296, %v985_v31 }
 0x285   : > { %v1015_v42 = vsub.f32 1.0, %v1011_v38  ;;  %v1012_v44 = vmul.f32 %v1710_v40, %v992_v39  ;;  %v1022_v43 = vsub.f32 0.0, %v1014_v35 }
 0x286   : > { %v993_v45 = vmul.f32 %v1704_v63, %v989_v41 }
 0x287   : > { %v1023_v46 = vsub.f32 0.0, %v1015_v42  ;;  %v1016_v62 = vsub.f32 1.0, %v1012_v44  ;;  %v1026_v50 = vsel %vm1018_vm5, %v1014_v35, %v1022_v43 }
 0x288   : > { %v1013_v47 = vmul.f32 %v1712_v2, %v993_v45  ;;  %v1030_v3 = vadd.f32 1.0, %v1026_v50 }
 0x289   : > { %v1024_v48 = vsub.f32 0.0, %v1016_v62  ;;  %v1027_v7 = vsel %vm1019_vm4, %v1015_v42, %v1023_v46 }
 0x28a   : > { %v1017_v49 = vsub.f32 1.0, %v1013_v47  ;;  %v1031_v55 = vadd.f32 1.0, %v1027_v7  ;;  %v1034_v61 = vmul.f32 %v1030_v3, %v930_v28  ;;  %v1714_v22 = vpop.eup %1713 }
 0x28b   : > { %v1028_v51 = vsel %vm1020_vm6, %v1016_v62, %v1024_v48  ;;  %v409_v17 = vmul.f32 %v1714_v22, %v2154_v18  ;;  %v1716_v29 = vpop.eup %1715 }
 0x28c   : > { %v1032_v52 = vadd.f32 1.0, %v1028_v51  ;;  %v1025_v12 = vsub.f32 0.0, %v1017_v49  ;;  %v1035_v58 = vmul.f32 %v1031_v55, %v931_v26  ;;  %v410_v6 = vmul.f32 %v1716_v29, %v2157_v19 }
 0x28e   : > { %v1029_v63 = vsel %vm1021_vm7, %v1017_v49, %v1025_v12  ;;  %v1036_v60 = vmul.f32 %v1032_v52, %v932_v57  ;;  %v1475_v9 = vpack.c.bf16 %v410_v6, %v409_v17 }
 0x28f   : > { %v1033_v21 = vadd.f32 1.0, %v1029_v63 }
 0x290   : > { %v1038_v1 = vpack.c.bf16 %v1036_v60, %v1034_v61  ;;  %1476 = vst [vmem:[%s394_s10] sm:$0xff] %v1475_v9  }
 0x291   : > { %v1037_v59 = vmul.f32 %v1033_v21, %v933_v8 }
 0x293   : > { %v1039_v0 = vpack.c.bf16 %v1037_v59, %v1035_v58 }
 0x295   : > { %1207 = vmatprep.mubr.bf16.mxu0 %v1039_v0 }
 0x296   : > { %1208 = vmatmul.mubr.bf16.vlgmr.msra.gmra.mxu0 %v1038_v1 }
 0x356   : > { %v1493_v10 = vpop.f32.mrf.mxu0 }
 0x358   : > { %v1494_v13 = vpop.f32.mrf.mxu0 }
 0x359   : > { %v1495_v14 = vadd.f32 %v1494_v13, %v1493_v10 }
 0x35a   : > { %v1496_v18 = vpop.f32.mrf.mxu0 }
 0x35b   : > { %v1210_v19 = vadd.f32 %v1495_v14, %v1446_v11 }
 0x35c   : > { %v1497_v15 = vpop.f32.mrf.mxu0 }
 0x35d   : > { %1216 = vst [vmem:[%s380_s23] sm:$0xff] %v1210_v19  ;;  %v1498_v16 = vadd.f32 %v1497_v15, %v1496_v18 }
 0x35f   : > { %v1213_v20 = vadd.f32 %v1498_v16, %v1446_v11 }
 0x361   : > { %1217 = vst [vmem:[%s380_s23 + $0x8] sm:$0xff] %v1213_v20 }
 0x362   : > { %1862 = shalt.err (!%p1859_p6)
}
 0x363   : > { %s1863_s20 = scalar_lea.hbm %s2261_s13, 256  ;;  %s1867_s21 = scalar_lea.hbm %s2311_s7, 512 }
 0x364   : > { %p1864_p4 = scmp.ne.s32.totalorder %s2261_s13, %s1863_s20  ;;  %p1868_p11 = scmp.lt.s32.totalorder %s2261_s13, %s2311_s7 }
 0x365   : > { %p1869_p0 = scmp.lt.s32.totalorder %s1867_s21, %s1863_s20 }
 0x366   : > { %p1865_p8 = pnand %p1864_p4, %p2338_p10 }
 0x367   : > { %p1870_p2 = por %p1869_p0, %p1868_p11 }
 0x368   : > { %p1866_p1 = pneg %p1865_p8 }
 0x36a   : > { %p1871_p12 = pnand %p1870_p2, %p1866_p1 }
 0x36c   : > { %1874 = shalt.err (!%p1871_p12)
}
 0x36d   : > { %s1934_s17 = smov 128   ;;  %s1935_s11 = smov 8  }
 0x36e   : > { %1517 = dma.vmem_to_hbm [thread:$0]  (%p2338_p10), %s2256_s25, 256, %s2261_s13, %s1219_s2, %s1934_s17, %s1934_s17, %s1935_s11  }
 0x36f PF: > { %s1256_s22 = sand.u32 1, %s1909_s27   ;;  %p2339_p7 = scmp.ne.s32.totalorder %s2322_s12, 0 }
 0x370   : > { %p2340_p9 = scmp.ge.s32.totalorder %s1921_s30, 2  ;;  %s1257_s9 = scalar_lea.sflag [#allocation4], %s1256_s22 }
 0x372   : > { %p1537_p13 = pnand %p2340_p9, %p2339_p7 }
 0x374   : > { %p1538_p3 = pneg %p1537_p13 }
 0x376   : > { %1904 = dma.done.wait (%p1538_p3), %s1257_s9, 256  }
 0x377   : > { %1906 = vsyncadd (%p1538_p3), %s1257_s9, 4294967040  ;;  %p24_p5 = scmp.ge.s32.totalorder %s2075_s14, 4   ;;  %s2341_s27 = smov %s1913_s28 }
 0x378   : > { %s2342_s28 = smov %s1917_s29  ;;  %s2343_s29 = smov %s2084_s19 }
 0x379   : > { %s2344_s30 = smov %s2075_s14  ;;  %26 = sbr.rel (!%p24_p5) target bundleno = 10 (0xa), region = 121 }
 0x37e   :  { %1270 = vsyncpa [#allocation3], 1 }
 0x37f   :  { %1272 = vsyncpa [#allocation3 + $0x1], 1 }
 0x380   :  { %1273 = vsyncpa [#allocation6], 1 }
 0x381   :  { %1274 = vsyncpa [#allocation9], 1 }
 0x382   :  { %1275 = vsyncpa [#allocation4], 1 }
 0x383   :  { %1277 = vsyncpa [#allocation4 + $0x1], 1 }

</bundles_post_ra>
